<compile_context>
chip_gen: v7x
topology: tpu7x:2x2x1
jax: 0.10.0
libtpu: 0.0.40
codegen_flags: <defaults>
</compile_context>

<pallas_src>
import jax
import jax.numpy as jnp
from jax import lax
from jax.experimental import pallas as pl
from jax.experimental.pallas import tpu as pltpu


# --------------------------------- kernel ----------------------------------

def _make_intensity_kernel(w_ll, w_lh, w_hl, w_hh, strided_rows):
    """Kernel factory; loss weights (Haar 1/2 norm folded in) are constants."""

    def kernel(ir_ref, vis_ref, fu_ref, o_ref):
        tb, th, w = ir_ref.shape          # static block shape
        th2 = th // 2
        wh = w - 1                        # horizontal-pair positions (valid at even cols)

        if strided_rows:
            # Vertical Haar pairing straight from stride-2 sublane reads: every
            # downstream op runs on th/2 rows (the true DWT row grid).
            def vert_pair(ref):
                xe = ref[:, pl.ds(0, th2, stride=2), :].astype(jnp.float32)
                xo = ref[:, pl.ds(1, th2, stride=2), :].astype(jnp.float32)
                return xe + xo, xe - xo
        else:
            # Fallback (known-good constructs): adjacent-row pairing at every
            # row; odd rows are garbage and get masked after the batch reduce.
            def vert_pair(ref):
                x = ref[...].astype(jnp.float32)
                top, bot = x[:, : th - 1, :], x[:, 1:, :]
                return top + bot, top - bot

        vs_ir, vd_ir = vert_pair(ir_ref)     # vertical pair sums / diffs
        vs_vi, vd_vi = vert_pair(vis_ref)
        vs_fu, vd_fu = vert_pair(fu_ref)
        rows = vs_ir.shape[1]

        def two_band_partial(p_ir, p_vi, p_fu, w_plus, w_minus):
            # Horizontal pairing of column j with j+1 (Haar-valid at even j).
            l_ir, r_ir = p_ir[:, :, :wh], p_ir[:, :, 1:]
            l_vi, r_vi = p_vi[:, :, :wh], p_vi[:, :, 1:]
            l_fu, r_fu = p_fu[:, :, :wh], p_fu[:, :, 1:]
            plus = jnp.abs((l_fu + r_fu) - jnp.maximum(l_ir + r_ir, l_vi + r_vi))
            minus = jnp.abs((l_fu - r_fu) - jnp.maximum(l_ir - r_ir, l_vi - r_vi))
            t = w_plus * plus + w_minus * minus            # (tb, rows, wh)
            # Batch-plane reduce = pure vreg adds; row reduce = per-lane adds.
            s = jnp.sum(t, axis=0)                         # (rows, wh)
            if not strided_rows:
                ri = lax.broadcasted_iota(jnp.int32, (rows, 1), 0)
                s = s * ((ri % 2) == 0).astype(jnp.float32)
            return jnp.sum(s, axis=0, keepdims=True)       # (1, wh)

        # Band-by-band accumulation: LL/LH from vertical sums, HL/HH from diffs.
        acc = two_band_partial(vs_ir, vs_vi, vs_fu, w_ll, w_lh)
        acc = acc + two_band_partial(vd_ir, vd_vi, vd_fu, w_hl, w_hh)

        # Even-column (lane) mask applied once on the per-lane partial.
        ci = lax.broadcasted_iota(jnp.int32, (1, wh), 1)
        acc = acc * ((ci % 2) == 0).astype(jnp.float32)

        # Single small cross-lane reduce per grid step; lane-dense (8,128) store.
        partial = jnp.sum(acc)
        o_ref[...] = jnp.full(o_ref.shape, partial, dtype=o_ref.dtype)

    return kernel


# --------------------------------- wrapper ---------------------------------

def _largest_divisor_leq(n, limit, multiple_of=1):
    hi = max(1, min(n, limit))
    for c in range(hi, 0, -1):
        if n % c == 0 and c % multiple_of == 0:
            return c
    return None


def _choose_tiles(b, h, w, esize, block_bytes):
    """Pick (TB, TH) dividing (B, H) exactly (no padding copies) with a grid
    step of roughly `block_bytes` per input.  TH is even (multiple of 8 when
    row-tiling) so Haar 2x2 blocks never straddle a tile boundary."""
    row_bytes = w * esize
    plane_bytes = h * row_bytes
    if plane_bytes <= block_bytes:
        th = h
        tb = _largest_divisor_leq(b, max(1, block_bytes // plane_bytes)) or 1
    else:
        tb = 1
        row_budget = max(8, block_bytes // row_bytes)
        th = _largest_divisor_leq(h, row_budget, multiple_of=8)
        if th is None:
            cands = [c for c in range(8, h + 1, 8) if h % c == 0]
            th = cands[0] if cands else h
    # Megacore (v7x has 2 TensorCores): guarantee >= 2 parallel grid steps.
    if (b // tb) * (h // th) == 1:
        if tb % 2 == 0 and tb >= 2:
            tb //= 2
        elif th % 16 == 0 and th >= 16:
            th //= 2
    return tb, th


def _intensity_partials(a, v, f, weights, tb, th, strided_rows):
    b, h, w = a.shape
    nb, nh = b // tb, h // th
    esize = jnp.dtype(a.dtype).itemsize
    kernel = _make_intensity_kernel(*weights, strided_rows)

    in_spec = pl.BlockSpec((tb, th, w), lambda i, j: (i, j, 0))
    out_spec = pl.BlockSpec((1, 1, 8, 128), lambda i, j: (i, j, 0, 0))

    tile_in = tb * th * w * esize
    tile_f32 = tb * th * w * 4
    # Inputs are double-buffered by the pipeline; f32 intermediates are ~half
    # spatial size thanks to the early vertical pairing.  Cap well under v7x's
    # 64 MiB physical VMEM.
    vmem_limit = int(min(100 << 20, max(48 << 20, 6 * tile_in + 10 * tile_f32)))

    flops = 22 * b * h * w                       # rough elementwise-op count
    bytes_accessed = 3 * b * h * w * esize + nb * nh * 8 * 128 * 4

    return pl.pallas_call(
        kernel,
        out_shape=jax.ShapeDtypeStruct((nb, nh, 8, 128), jnp.float32),
        grid=(nb, nh),
        in_specs=[in_spec, in_spec, in_spec],
        out_specs=out_spec,
        compiler_params=pltpu.CompilerParams(
            dimension_semantics=("parallel", "parallel"),
            vmem_limit_bytes=vmem_limit,
        ),
        cost_estimate=pl.CostEstimate(
            flops=flops, transcendentals=0, bytes_accessed=bytes_accessed),
    )(a, v, f)


def l_intensity(image_A, image_B, image_fused, *, r: float = 0.5,
                block_bytes: int = 2 << 20, strided_rows=None):
    """JAX/Pallas forward of L_Intensity. Inputs (N, C, H, W); returns scalar."""
    assert image_A.shape == image_B.shape == image_fused.shape
    n, c, h, w = image_A.shape
    assert h % 2 == 0 and w % 2 == 0, "Haar DWT needs even spatial dims"
    b = n * c

    # Merging leading dims only: layout-preserving, no HBM relayout copy.
    a = image_A.reshape(b, h, w)
    v = image_B.reshape(b, h, w)
    f = image_fused.reshape(b, h, w)

    rr = float(r)
    s = 1.0 - rr
    # Fold the Haar 1/2 normalisation into the loss weights
    # (valid because max(x/2, y/2) == max(x, y) / 2).
    weights = (0.5 * rr * rr, 0.5 * rr * s, 0.5 * rr * s, 0.5 * s * s)

    esize = jnp.dtype(image_A.dtype).itemsize
    tb, th = _choose_tiles(b, h, w, esize, block_bytes)

    # Prefer the fast stride-2 row-read kernel; fall back to the mask-based
    # variant if this toolchain's Mosaic rejects strided sublane reads.
    modes = (True, False) if strided_rows is None else (bool(strided_rows),)
    partials, last_err = None, None
    for mode in modes:
        try:
            partials = _intensity_partials(a, v, f, weights, tb, th, mode)
            partials = jax.block_until_ready(partials)
            break
        except Exception as err:  # noqa: BLE001 - lowering rejection fallback
            last_err = err
            partials = None
    if partials is None:
        raise last_err

    total = jnp.sum(partials[:, :, 0, 0])
    count = b * (h // 2) * (w // 2)   # per-subband element count
    return total / jnp.float32(count)


# ----------------------------- pure-JAX reference -----------------------------

def _haar_dwt_ref(x):
    x = x.astype(jnp.float32)
    a = x[:, :, 0::2, 0::2]
    b = x[:, :, 0::2, 1::2]
    c = x[:, :, 1::2, 0::2]
    d = x[:, :, 1::2, 1::2]
    ll = (a + b + c + d) * 0.5
    lh = (a - b + c - d) * 0.5
    hl = (a + b - c - d) * 0.5
    hh = (a - b - c + d) * 0.5
    return ll, lh, hl, hh


def l_intensity_reference(image_A, image_B, image_fused, r: float = 0.5):
    s = 1.0 - r
    ws = (r * r, r * s, r * s, s * s)
    sub_a = _haar_dwt_ref(image_A)
    sub_b = _haar_dwt_ref(image_B)
    sub_f = _haar_dwt_ref(image_fused)
    loss = jnp.float32(0.0)
    for w, xa, xb, xf in zip(ws, sub_a, sub_b, sub_f):
        loss = loss + w * jnp.mean(jnp.abs(xf - jnp.maximum(xa, xb)))
    return loss


if __name__ == "__main__":
    key = jax.random.PRNGKey(0)
    k1, k2, k3 = jax.random.split(key, 3)
    shape = (2, 4, 16, 16)  # (N, C, H, W)
    image_A = jax.random.normal(k1, shape, dtype=jnp.float32)
    image_B = jax.random.normal(k2, shape, dtype=jnp.float32)
    image_F = jax.random.normal(k3, shape, dtype=jnp.float32)
    r = 0.3  # TODO(synk): args.r comes from an external config in the original.

    loss = l_intensity(image_A, image_B, image_F, r=r)
    loss = jax.block_until_ready(loss)

    ref = l_intensity_reference(image_A, image_B, image_F, r=r)
    assert loss.shape == (), loss.shape
    assert bool(jnp.isfinite(loss)), "non-finite loss"
    assert jnp.allclose(loss, ref, atol=1e-5, rtol=1e-5), (float(loss), float(ref))

    print("KERNEL_OK")
</pallas_src>

<mosaic_0001>
module attributes {stable_mosaic.version = 11 : i64} {
  func.func @kernel(%arg0: i32, %arg1: i32, %arg2: memref<4x16x16xf32, #tpu.memory_space<vmem>>, %arg3: memref<4x16x16xf32, #tpu.memory_space<vmem>>, %arg4: memref<4x16x16xf32, #tpu.memory_space<vmem>>, %arg5: memref<1x1x8x128xf32, #tpu.memory_space<vmem>>) attributes {dimension_semantics = [#tpu.dimension_semantics<parallel>, #tpu.dimension_semantics<parallel>], iteration_bounds = array<i64: 2, 1>, scalar_prefetch = 0 : i64, scratch_operands = 0 : i64, tpu.core_type = #tpu.core_type<tc>, window_params = [{transform_indices = @transform_0, window_bounds = array<i64: 4, 16, 16>}, {transform_indices = @transform_1, window_bounds = array<i64: 4, 16, 16>}, {transform_indices = @transform_2, window_bounds = array<i64: 4, 16, 16>}, {transform_indices = @transform_3, window_bounds = array<i64: 1, 1, 8, 128>}]} {
    %c0 = arith.constant 0 : index
    %c0_0 = arith.constant 0 : index
    %c0_1 = arith.constant 0 : index
    %0 = tpu.strided_load %arg2[%c0, %c0_0, %c0_1] {strides = array<i32: 1, 2, 1>} : memref<4x16x16xf32, #tpu.memory_space<vmem>>, vector<4x8x16xf32>
    %c0_2 = arith.constant 0 : index
    %c1 = arith.constant 1 : index
    %c0_3 = arith.constant 0 : index
    %1 = tpu.strided_load %arg2[%c0_2, %c1, %c0_3] {strides = array<i32: 1, 2, 1>} : memref<4x16x16xf32, #tpu.memory_space<vmem>>, vector<4x8x16xf32>
    %2 = arith.addf %0, %1 : vector<4x8x16xf32>
    %3 = arith.subf %0, %1 : vector<4x8x16xf32>
    %c0_4 = arith.constant 0 : index
    %c0_5 = arith.constant 0 : index
    %c0_6 = arith.constant 0 : index
    %4 = tpu.strided_load %arg3[%c0_4, %c0_5, %c0_6] {strides = array<i32: 1, 2, 1>} : memref<4x16x16xf32, #tpu.memory_space<vmem>>, vector<4x8x16xf32>
    %c0_7 = arith.constant 0 : index
    %c1_8 = arith.constant 1 : index
    %c0_9 = arith.constant 0 : index
    %5 = tpu.strided_load %arg3[%c0_7, %c1_8, %c0_9] {strides = array<i32: 1, 2, 1>} : memref<4x16x16xf32, #tpu.memory_space<vmem>>, vector<4x8x16xf32>
    %6 = arith.addf %4, %5 : vector<4x8x16xf32>
    %7 = arith.subf %4, %5 : vector<4x8x16xf32>
    %c0_10 = arith.constant 0 : index
    %c0_11 = arith.constant 0 : index
    %c0_12 = arith.constant 0 : index
    %8 = tpu.strided_load %arg4[%c0_10, %c0_11, %c0_12] {strides = array<i32: 1, 2, 1>} : memref<4x16x16xf32, #tpu.memory_space<vmem>>, vector<4x8x16xf32>
    %c0_13 = arith.constant 0 : index
    %c1_14 = arith.constant 1 : index
    %c0_15 = arith.constant 0 : index
    %9 = tpu.strided_load %arg4[%c0_13, %c1_14, %c0_15] {strides = array<i32: 1, 2, 1>} : memref<4x16x16xf32, #tpu.memory_space<vmem>>, vector<4x8x16xf32>
    %10 = arith.addf %8, %9 : vector<4x8x16xf32>
    %11 = arith.subf %8, %9 : vector<4x8x16xf32>
    %12 = vector.extract_strided_slice %2 {offsets = [0, 0, 0], sizes = [4, 8, 15], strides = [1, 1, 1]} : vector<4x8x16xf32> to vector<4x8x15xf32>
    %13 = vector.extract_strided_slice %2 {offsets = [0, 0, 1], sizes = [4, 8, 15], strides = [1, 1, 1]} : vector<4x8x16xf32> to vector<4x8x15xf32>
    %14 = vector.extract_strided_slice %6 {offsets = [0, 0, 0], sizes = [4, 8, 15], strides = [1, 1, 1]} : vector<4x8x16xf32> to vector<4x8x15xf32>
    %15 = vector.extract_strided_slice %6 {offsets = [0, 0, 1], sizes = [4, 8, 15], strides = [1, 1, 1]} : vector<4x8x16xf32> to vector<4x8x15xf32>
    %16 = vector.extract_strided_slice %10 {offsets = [0, 0, 0], sizes = [4, 8, 15], strides = [1, 1, 1]} : vector<4x8x16xf32> to vector<4x8x15xf32>
    %17 = vector.extract_strided_slice %10 {offsets = [0, 0, 1], sizes = [4, 8, 15], strides = [1, 1, 1]} : vector<4x8x16xf32> to vector<4x8x15xf32>
    %18 = arith.addf %16, %17 : vector<4x8x15xf32>
    %19 = arith.addf %12, %13 : vector<4x8x15xf32>
    %20 = arith.addf %14, %15 : vector<4x8x15xf32>
    %21 = arith.maximumf %19, %20 : vector<4x8x15xf32>
    %22 = arith.subf %18, %21 : vector<4x8x15xf32>
    %23 = math.absf %22 : vector<4x8x15xf32>
    %24 = arith.subf %16, %17 : vector<4x8x15xf32>
    %25 = arith.subf %12, %13 : vector<4x8x15xf32>
    %26 = arith.subf %14, %15 : vector<4x8x15xf32>
    %27 = arith.maximumf %25, %26 : vector<4x8x15xf32>
    %28 = arith.subf %24, %27 : vector<4x8x15xf32>
    %29 = math.absf %28 : vector<4x8x15xf32>
    %cst = arith.constant 4.500000e-02 : f32
    %30 = vector.broadcast %cst : f32 to vector<4x8x15xf32>
    %31 = arith.mulf %30, %23 : vector<4x8x15xf32>
    %cst_16 = arith.constant 1.050000e-01 : f32
    %32 = vector.broadcast %cst_16 : f32 to vector<4x8x15xf32>
    %33 = arith.mulf %32, %29 : vector<4x8x15xf32>
    %34 = arith.addf %31, %33 : vector<4x8x15xf32>
    %cst_17 = arith.constant dense<0.000000e+00> : vector<8x15xf32>
    %35 = vector.multi_reduction <add>, %34, %cst_17 [0] : vector<4x8x15xf32> to vector<8x15xf32>
    %cst_18 = arith.constant dense<0.000000e+00> : vector<15xf32>
    %36 = vector.multi_reduction <add>, %35, %cst_18 [0] : vector<8x15xf32> to vector<15xf32>
    %37 = vector.shape_cast %36 : vector<15xf32> to vector<1x15xf32>
    %38 = vector.extract_strided_slice %3 {offsets = [0, 0, 0], sizes = [4, 8, 15], strides = [1, 1, 1]} : vector<4x8x16xf32> to vector<4x8x15xf32>
    %39 = vector.extract_strided_slice %3 {offsets = [0, 0, 1], sizes = [4, 8, 15], strides = [1, 1, 1]} : vector<4x8x16xf32> to vector<4x8x15xf32>
    %40 = vector.extract_strided_slice %7 {offsets = [0, 0, 0], sizes = [4, 8, 15], strides = [1, 1, 1]} : vector<4x8x16xf32> to vector<4x8x15xf32>
    %41 = vector.extract_strided_slice %7 {offsets = [0, 0, 1], sizes = [4, 8, 15], strides = [1, 1, 1]} : vector<4x8x16xf32> to vector<4x8x15xf32>
    %42 = vector.extract_strided_slice %11 {offsets = [0, 0, 0], sizes = [4, 8, 15], strides = [1, 1, 1]} : vector<4x8x16xf32> to vector<4x8x15xf32>
    %43 = vector.extract_strided_slice %11 {offsets = [0, 0, 1], sizes = [4, 8, 15], strides = [1, 1, 1]} : vector<4x8x16xf32> to vector<4x8x15xf32>
    %44 = arith.addf %42, %43 : vector<4x8x15xf32>
    %45 = arith.addf %38, %39 : vector<4x8x15xf32>
    %46 = arith.addf %40, %41 : vector<4x8x15xf32>
    %47 = arith.maximumf %45, %46 : vector<4x8x15xf32>
    %48 = arith.subf %44, %47 : vector<4x8x15xf32>
    %49 = math.absf %48 : vector<4x8x15xf32>
    %50 = arith.subf %42, %43 : vector<4x8x15xf32>
    %51 = arith.subf %38, %39 : vector<4x8x15xf32>
    %52 = arith.subf %40, %41 : vector<4x8x15xf32>
    %53 = arith.maximumf %51, %52 : vector<4x8x15xf32>
    %54 = arith.subf %50, %53 : vector<4x8x15xf32>
    %55 = math.absf %54 : vector<4x8x15xf32>
    %cst_19 = arith.constant 1.050000e-01 : f32
    %56 = vector.broadcast %cst_19 : f32 to vector<4x8x15xf32>
    %57 = arith.mulf %56, %49 : vector<4x8x15xf32>
    %cst_20 = arith.constant 2.450000e-01 : f32
    %58 = vector.broadcast %cst_20 : f32 to vector<4x8x15xf32>
    %59 = arith.mulf %58, %55 : vector<4x8x15xf32>
    %60 = arith.addf %57, %59 : vector<4x8x15xf32>
    %cst_21 = arith.constant dense<0.000000e+00> : vector<8x15xf32>
    %61 = vector.multi_reduction <add>, %60, %cst_21 [0] : vector<4x8x15xf32> to vector<8x15xf32>
    %cst_22 = arith.constant dense<0.000000e+00> : vector<15xf32>
    %62 = vector.multi_reduction <add>, %61, %cst_22 [0] : vector<8x15xf32> to vector<15xf32>
    %63 = vector.shape_cast %62 : vector<15xf32> to vector<1x15xf32>
    %64 = arith.addf %37, %63 : vector<1x15xf32>
    %65 = tpu.iota {dimensions = array<i32: 1>} : vector<1x15xi32>
    %c2_i32 = arith.constant 2 : i32
    %c0_i32 = arith.constant 0 : i32
    %66 = arith.cmpi eq, %c2_i32, %c0_i32 : i32
    %c1_i32 = arith.constant 1 : i32
    %67 = arith.select %66, %c1_i32, %c2_i32 : i32
    %68 = vector.broadcast %67 : i32 to vector<1x15xi32>
    %69 = arith.remsi %65, %68 : vector<1x15xi32>
    %c0_i32_23 = arith.constant 0 : i32
    %70 = vector.broadcast %c0_i32_23 : i32 to vector<1x15xi32>
    %71 = arith.cmpi ne, %69, %70 : vector<1x15xi32>
    %c0_i32_24 = arith.constant 0 : i32
    %72 = vector.broadcast %c0_i32_24 : i32 to vector<1x15xi32>
    %73 = arith.cmpi slt, %69, %72 : vector<1x15xi32>
    %c0_i32_25 = arith.constant 0 : i32
    %74 = arith.cmpi slt, %67, %c0_i32_25 : i32
    %75 = vector.broadcast %74 : i1 to vector<1x15xi1>
    %76 = vector.broadcast %75 : vector<1x15xi1> to vector<1x15xi1>
    %77 = arith.xori %73, %76 : vector<1x15xi1>
    %78 = arith.andi %77, %71 : vector<1x15xi1>
    %79 = vector.broadcast %67 : i32 to vector<1x15xi32>
    %80 = arith.addi %69, %79 : vector<1x15xi32>
    %81 = arith.select %78, %80, %69 : vector<1x15xi1>, vector<1x15xi32>
    %c0_i32_26 = arith.constant 0 : i32
    %82 = vector.broadcast %c0_i32_26 : i32 to vector<1x15xi32>
    %83 = arith.cmpi eq, %81, %82 : vector<1x15xi32>
    %84 = arith.extui %83 : vector<1x15xi1> to vector<1x15xi32>
    %85 = arith.sitofp %84 : vector<1x15xi32> to vector<1x15xf32>
    %86 = arith.mulf %64, %85 : vector<1x15xf32>
    %87 = vector.shape_cast %86 : vector<1x15xf32> to vector<1x1x15xf32>
    %cst_27 = arith.constant dense<0.000000e+00> : vector<1xf32>
    %88 = vector.multi_reduction <add>, %87, %cst_27 [1, 2] : vector<1x1x15xf32> to vector<1xf32>
    %89 = vector.shape_cast %88 : vector<1xf32> to vector<1x1x1xf32>
    %90 = vector.extract %89[0, 0, 0] : f32 from vector<1x1x1xf32>
    %91 = vector.broadcast %90 : f32 to vector<1x1x8x128xf32>
    %c0_28 = arith.constant 0 : index
    %c0_29 = arith.constant 0 : index
    %c0_30 = arith.constant 0 : index
    %c0_31 = arith.constant 0 : index
    %92 = vector.load %arg5[%c0_28, %c0_29, %c0_30, %c0_31] : memref<1x1x8x128xf32, #tpu.memory_space<vmem>>, vector<1x1x8x128xf32>
    tpu.vector_store %arg5[%c0_28, %c0_29, %c0_30, %c0_31], %91 {strides = array<i32>} : memref<1x1x8x128xf32, #tpu.memory_space<vmem>>, vector<1x1x8x128xf32>,
    return
  }
  func.func @transform_0(%arg0: i32, %arg1: i32) -> (i32, i32, i32) {
    %c0_i32 = arith.constant 0 : i32
    %c0_i32_0 = arith.constant 0 : i32
    return %arg0, %arg1, %c0_i32 : i32, i32, i32
  }
  func.func @transform_1(%arg0: i32, %arg1: i32) -> (i32, i32, i32) {
    %c0_i32 = arith.constant 0 : i32
    %c0_i32_0 = arith.constant 0 : i32
    return %arg0, %arg1, %c0_i32 : i32, i32, i32
  }
  func.func @transform_2(%arg0: i32, %arg1: i32) -> (i32, i32, i32) {
    %c0_i32 = arith.constant 0 : i32
    %c0_i32_0 = arith.constant 0 : i32
    return %arg0, %arg1, %c0_i32 : i32, i32, i32
  }
  func.func @transform_3(%arg0: i32, %arg1: i32) -> (i32, i32, i32, i32) {
    %c0_i32 = arith.constant 0 : i32
    %c0_i32_0 = arith.constant 0 : i32
    %c0_i32_1 = arith.constant 0 : i32
    return %arg0, %arg1, %c0_i32, %c0_i32_0 : i32, i32, i32, i32
  }
}

module attributes {stable_mosaic.version = 11 : i64} {
  func.func @kernel(%arg0: i32, %arg1: i32, %arg2: memref<4x16x16xf32, #tpu.memory_space<vmem>>, %arg3: memref<4x16x16xf32, #tpu.memory_space<vmem>>, %arg4: memref<4x16x16xf32, #tpu.memory_space<vmem>>, %arg5: memref<1x1x8x128xf32, #tpu.memory_space<vmem>>) attributes {dimension_semantics = [#tpu.dimension_semantics<parallel>, #tpu.dimension_semantics<parallel>], iteration_bounds = array<i64: 2, 1>, scalar_prefetch = 0 : i64, scratch_operands = 0 : i64, tpu.core_type = #tpu.core_type<tc>, window_params = [{transform_indices = @transform_0, window_bounds = array<i64: 4, 16, 16>}, {transform_indices = @transform_1, window_bounds = array<i64: 4, 16, 16>}, {transform_indices = @transform_2, window_bounds = array<i64: 4, 16, 16>}, {transform_indices = @transform_3, window_bounds = array<i64: 1, 1, 8, 128>}]} {
    %c0 = arith.constant 0 : index
    %c0_0 = arith.constant 0 : index
    %c0_1 = arith.constant 0 : index
    %0 = vector.load %arg2[%c0, %c0_0, %c0_1] : memref<4x16x16xf32, #tpu.memory_space<vmem>>, vector<4x16x16xf32>
    %1 = vector.extract_strided_slice %0 {offsets = [0, 0, 0], sizes = [4, 15, 16], strides = [1, 1, 1]} : vector<4x16x16xf32> to vector<4x15x16xf32>
    %2 = vector.extract_strided_slice %0 {offsets = [0, 1, 0], sizes = [4, 15, 16], strides = [1, 1, 1]} : vector<4x16x16xf32> to vector<4x15x16xf32>
    %3 = arith.addf %1, %2 : vector<4x15x16xf32>
    %4 = arith.subf %1, %2 : vector<4x15x16xf32>
    %c0_2 = arith.constant 0 : index
    %c0_3 = arith.constant 0 : index
    %c0_4 = arith.constant 0 : index
    %5 = vector.load %arg3[%c0_2, %c0_3, %c0_4] : memref<4x16x16xf32, #tpu.memory_space<vmem>>, vector<4x16x16xf32>
    %6 = vector.extract_strided_slice %5 {offsets = [0, 0, 0], sizes = [4, 15, 16], strides = [1, 1, 1]} : vector<4x16x16xf32> to vector<4x15x16xf32>
    %7 = vector.extract_strided_slice %5 {offsets = [0, 1, 0], sizes = [4, 15, 16], strides = [1, 1, 1]} : vector<4x16x16xf32> to vector<4x15x16xf32>
    %8 = arith.addf %6, %7 : vector<4x15x16xf32>
    %9 = arith.subf %6, %7 : vector<4x15x16xf32>
    %c0_5 = arith.constant 0 : index
    %c0_6 = arith.constant 0 : index
    %c0_7 = arith.constant 0 : index
    %10 = vector.load %arg4[%c0_5, %c0_6, %c0_7] : memref<4x16x16xf32, #tpu.memory_space<vmem>>, vector<4x16x16xf32>
    %11 = vector.extract_strided_slice %10 {offsets = [0, 0, 0], sizes = [4, 15, 16], strides = [1, 1, 1]} : vector<4x16x16xf32> to vector<4x15x16xf32>
    %12 = vector.extract_strided_slice %10 {offsets = [0, 1, 0], sizes = [4, 15, 16], strides = [1, 1, 1]} : vector<4x16x16xf32> to vector<4x15x16xf32>
    %13 = arith.addf %11, %12 : vector<4x15x16xf32>
    %14 = arith.subf %11, %12 : vector<4x15x16xf32>
    %15 = vector.extract_strided_slice %3 {offsets = [0, 0, 0], sizes = [4, 15, 15], strides = [1, 1, 1]} : vector<4x15x16xf32> to vector<4x15x15xf32>
    %16 = vector.extract_strided_slice %3 {offsets = [0, 0, 1], sizes = [4, 15, 15], strides = [1, 1, 1]} : vector<4x15x16xf32> to vector<4x15x15xf32>
    %17 = vector.extract_strided_slice %8 {offsets = [0, 0, 0], sizes = [4, 15, 15], strides = [1, 1, 1]} : vector<4x15x16xf32> to vector<4x15x15xf32>
    %18 = vector.extract_strided_slice %8 {offsets = [0, 0, 1], sizes = [4, 15, 15], strides = [1, 1, 1]} : vector<4x15x16xf32> to vector<4x15x15xf32>
    %19 = vector.extract_strided_slice %13 {offsets = [0, 0, 0], sizes = [4, 15, 15], strides = [1, 1, 1]} : vector<4x15x16xf32> to vector<4x15x15xf32>
    %20 = vector.extract_strided_slice %13 {offsets = [0, 0, 1], sizes = [4, 15, 15], strides = [1, 1, 1]} : vector<4x15x16xf32> to vector<4x15x15xf32>
    %21 = arith.addf %19, %20 : vector<4x15x15xf32>
    %22 = arith.addf %15, %16 : vector<4x15x15xf32>
    %23 = arith.addf %17, %18 : vector<4x15x15xf32>
    %24 = arith.maximumf %22, %23 : vector<4x15x15xf32>
    %25 = arith.subf %21, %24 : vector<4x15x15xf32>
    %26 = math.absf %25 : vector<4x15x15xf32>
    %27 = arith.subf %19, %20 : vector<4x15x15xf32>
    %28 = arith.subf %15, %16 : vector<4x15x15xf32>
    %29 = arith.subf %17, %18 : vector<4x15x15xf32>
    %30 = arith.maximumf %28, %29 : vector<4x15x15xf32>
    %31 = arith.subf %27, %30 : vector<4x15x15xf32>
    %32 = math.absf %31 : vector<4x15x15xf32>
    %cst = arith.constant 4.500000e-02 : f32
    %33 = vector.broadcast %cst : f32 to vector<4x15x15xf32>
    %34 = arith.mulf %33, %26 : vector<4x15x15xf32>
    %cst_8 = arith.constant 1.050000e-01 : f32
    %35 = vector.broadcast %cst_8 : f32 to vector<4x15x15xf32>
    %36 = arith.mulf %35, %32 : vector<4x15x15xf32>
    %37 = arith.addf %34, %36 : vector<4x15x15xf32>
    %cst_9 = arith.constant dense<0.000000e+00> : vector<15x15xf32>
    %38 = vector.multi_reduction <add>, %37, %cst_9 [0] : vector<4x15x15xf32> to vector<15x15xf32>
    %39 = tpu.iota {dimensions = array<i32: 0>} : vector<15x1xi32>
    %c2_i32 = arith.constant 2 : i32
    %c0_i32 = arith.constant 0 : i32
    %40 = arith.cmpi eq, %c2_i32, %c0_i32 : i32
    %c1_i32 = arith.constant 1 : i32
    %41 = arith.select %40, %c1_i32, %c2_i32 : i32
    %42 = vector.broadcast %41 : i32 to vector<15x1xi32>
    %43 = arith.remsi %39, %42 : vector<15x1xi32>
    %c0_i32_10 = arith.constant 0 : i32
    %44 = vector.broadcast %c0_i32_10 : i32 to vector<15x1xi32>
    %45 = arith.cmpi ne, %43, %44 : vector<15x1xi32>
    %c0_i32_11 = arith.constant 0 : i32
    %46 = vector.broadcast %c0_i32_11 : i32 to vector<15x1xi32>
    %47 = arith.cmpi slt, %43, %46 : vector<15x1xi32>
    %c0_i32_12 = arith.constant 0 : i32
    %48 = arith.cmpi slt, %41, %c0_i32_12 : i32
    %49 = vector.broadcast %48 : i1 to vector<15x1xi1>
    %50 = vector.broadcast %49 : vector<15x1xi1> to vector<15x1xi1>
    %51 = arith.xori %47, %50 : vector<15x1xi1>
    %52 = arith.andi %51, %45 : vector<15x1xi1>
    %53 = vector.broadcast %41 : i32 to vector<15x1xi32>
    %54 = arith.addi %43, %53 : vector<15x1xi32>
    %55 = arith.select %52, %54, %43 : vector<15x1xi1>, vector<15x1xi32>
    %c0_i32_13 = arith.constant 0 : i32
    %56 = vector.broadcast %c0_i32_13 : i32 to vector<15x1xi32>
    %57 = arith.cmpi eq, %55, %56 : vector<15x1xi32>
    %58 = arith.extui %57 : vector<15x1xi1> to vector<15x1xi32>
    %59 = arith.sitofp %58 : vector<15x1xi32> to vector<15x1xf32>
    %60 = vector.broadcast %59 : vector<15x1xf32> to vector<15x15xf32>
    %61 = arith.mulf %38, %60 : vector<15x15xf32>
    %cst_14 = arith.constant dense<0.000000e+00> : vector<15xf32>
    %62 = vector.multi_reduction <add>, %61, %cst_14 [0] : vector<15x15xf32> to vector<15xf32>
    %63 = vector.shape_cast %62 : vector<15xf32> to vector<1x15xf32>
    %64 = vector.extract_strided_slice %4 {offsets = [0, 0, 0], sizes = [4, 15, 15], strides = [1, 1, 1]} : vector<4x15x16xf32> to vector<4x15x15xf32>
    %65 = vector.extract_strided_slice %4 {offsets = [0, 0, 1], sizes = [4, 15, 15], strides = [1, 1, 1]} : vector<4x15x16xf32> to vector<4x15x15xf32>
    %66 = vector.extract_strided_slice %9 {offsets = [0, 0, 0], sizes = [4, 15, 15], strides = [1, 1, 1]} : vector<4x15x16xf32> to vector<4x15x15xf32>
    %67 = vector.extract_strided_slice %9 {offsets = [0, 0, 1], sizes = [4, 15, 15], strides = [1, 1, 1]} : vector<4x15x16xf32> to vector<4x15x15xf32>
    %68 = vector.extract_strided_slice %14 {offsets = [0, 0, 0], sizes = [4, 15, 15], strides = [1, 1, 1]} : vector<4x15x16xf32> to vector<4x15x15xf32>
    %69 = vector.extract_strided_slice %14 {offsets = [0, 0, 1], sizes = [4, 15, 15], strides = [1, 1, 1]} : vector<4x15x16xf32> to vector<4x15x15xf32>
    %70 = arith.addf %68, %69 : vector<4x15x15xf32>
    %71 = arith.addf %64, %65 : vector<4x15x15xf32>
    %72 = arith.addf %66, %67 : vector<4x15x15xf32>
    %73 = arith.maximumf %71, %72 : vector<4x15x15xf32>
    %74 = arith.subf %70, %73 : vector<4x15x15xf32>
    %75 = math.absf %74 : vector<4x15x15xf32>
    %76 = arith.subf %68, %69 : vector<4x15x15xf32>
    %77 = arith.subf %64, %65 : vector<4x15x15xf32>
    %78 = arith.subf %66, %67 : vector<4x15x15xf32>
    %79 = arith.maximumf %77, %78 : vector<4x15x15xf32>
    %80 = arith.subf %76, %79 : vector<4x15x15xf32>
    %81 = math.absf %80 : vector<4x15x15xf32>
    %cst_15 = arith.constant 1.050000e-01 : f32
    %82 = vector.broadcast %cst_15 : f32 to vector<4x15x15xf32>
    %83 = arith.mulf %82, %75 : vector<4x15x15xf32>
    %cst_16 = arith.constant 2.450000e-01 : f32
    %84 = vector.broadcast %cst_16 : f32 to vector<4x15x15xf32>
    %85 = arith.mulf %84, %81 : vector<4x15x15xf32>
    %86 = arith.addf %83, %85 : vector<4x15x15xf32>
    %cst_17 = arith.constant dense<0.000000e+00> : vector<15x15xf32>
    %87 = vector.multi_reduction <add>, %86, %cst_17 [0] : vector<4x15x15xf32> to vector<15x15xf32>
    %88 = tpu.iota {dimensions = array<i32: 0>} : vector<15x1xi32>
    %c2_i32_18 = arith.constant 2 : i32
    %c0_i32_19 = arith.constant 0 : i32
    %89 = arith.cmpi eq, %c2_i32_18, %c0_i32_19 : i32
    %c1_i32_20 = arith.constant 1 : i32
    %90 = arith.select %89, %c1_i32_20, %c2_i32_18 : i32
    %91 = vector.broadcast %90 : i32 to vector<15x1xi32>
    %92 = arith.remsi %88, %91 : vector<15x1xi32>
    %c0_i32_21 = arith.constant 0 : i32
    %93 = vector.broadcast %c0_i32_21 : i32 to vector<15x1xi32>
    %94 = arith.cmpi ne, %92, %93 : vector<15x1xi32>
    %c0_i32_22 = arith.constant 0 : i32
    %95 = vector.broadcast %c0_i32_22 : i32 to vector<15x1xi32>
    %96 = arith.cmpi slt, %92, %95 : vector<15x1xi32>
    %c0_i32_23 = arith.constant 0 : i32
    %97 = arith.cmpi slt, %90, %c0_i32_23 : i32
    %98 = vector.broadcast %97 : i1 to vector<15x1xi1>
    %99 = vector.broadcast %98 : vector<15x1xi1> to vector<15x1xi1>
    %100 = arith.xori %96, %99 : vector<15x1xi1>
    %101 = arith.andi %100, %94 : vector<15x1xi1>
    %102 = vector.broadcast %90 : i32 to vector<15x1xi32>
    %103 = arith.addi %92, %102 : vector<15x1xi32>
    %104 = arith.select %101, %103, %92 : vector<15x1xi1>, vector<15x1xi32>
    %c0_i32_24 = arith.constant 0 : i32
    %105 = vector.broadcast %c0_i32_24 : i32 to vector<15x1xi32>
    %106 = arith.cmpi eq, %104, %105 : vector<15x1xi32>
    %107 = arith.extui %106 : vector<15x1xi1> to vector<15x1xi32>
    %108 = arith.sitofp %107 : vector<15x1xi32> to vector<15x1xf32>
    %109 = vector.broadcast %108 : vector<15x1xf32> to vector<15x15xf32>
    %110 = arith.mulf %87, %109 : vector<15x15xf32>
    %cst_25 = arith.constant dense<0.000000e+00> : vector<15xf32>
    %111 = vector.multi_reduction <add>, %110, %cst_25 [0] : vector<15x15xf32> to vector<15xf32>
    %112 = vector.shape_cast %111 : vector<15xf32> to vector<1x15xf32>
    %113 = arith.addf %63, %112 : vector<1x15xf32>
    %114 = tpu.iota {dimensions = array<i32: 1>} : vector<1x15xi32>
    %c2_i32_26 = arith.constant 2 : i32
    %c0_i32_27 = arith.constant 0 : i32
    %115 = arith.cmpi eq, %c2_i32_26, %c0_i32_27 : i32
    %c1_i32_28 = arith.constant 1 : i32
    %116 = arith.select %115, %c1_i32_28, %c2_i32_26 : i32
    %117 = vector.broadcast %116 : i32 to vector<1x15xi32>
    %118 = arith.remsi %114, %117 : vector<1x15xi32>
    %c0_i32_29 = arith.constant 0 : i32
    %119 = vector.broadcast %c0_i32_29 : i32 to vector<1x15xi32>
    %120 = arith.cmpi ne, %118, %119 : vector<1x15xi32>
    %c0_i32_30 = arith.constant 0 : i32
    %121 = vector.broadcast %c0_i32_30 : i32 to vector<1x15xi32>
    %122 = arith.cmpi slt, %118, %121 : vector<1x15xi32>
    %c0_i32_31 = arith.constant 0 : i32
    %123 = arith.cmpi slt, %116, %c0_i32_31 : i32
    %124 = vector.broadcast %123 : i1 to vector<1x15xi1>
    %125 = vector.broadcast %124 : vector<1x15xi1> to vector<1x15xi1>
    %126 = arith.xori %122, %125 : vector<1x15xi1>
    %127 = arith.andi %126, %120 : vector<1x15xi1>
    %128 = vector.broadcast %116 : i32 to vector<1x15xi32>
    %129 = arith.addi %118, %128 : vector<1x15xi32>
    %130 = arith.select %127, %129, %118 : vector<1x15xi1>, vector<1x15xi32>
    %c0_i32_32 = arith.constant 0 : i32
    %131 = vector.broadcast %c0_i32_32 : i32 to vector<1x15xi32>
    %132 = arith.cmpi eq, %130, %131 : vector<1x15xi32>
    %133 = arith.extui %132 : vector<1x15xi1> to vector<1x15xi32>
    %134 = arith.sitofp %133 : vector<1x15xi32> to vector<1x15xf32>
    %135 = arith.mulf %113, %134 : vector<1x15xf32>
    %136 = vector.shape_cast %135 : vector<1x15xf32> to vector<1x1x15xf32>
    %cst_33 = arith.constant dense<0.000000e+00> : vector<1xf32>
    %137 = vector.multi_reduction <add>, %136, %cst_33 [1, 2] : vector<1x1x15xf32> to vector<1xf32>
    %138 = vector.shape_cast %137 : vector<1xf32> to vector<1x1x1xf32>
    %139 = vector.extract %138[0, 0, 0] : f32 from vector<1x1x1xf32>
    %140 = vector.broadcast %139 : f32 to vector<1x1x8x128xf32>
    %c0_34 = arith.constant 0 : index
    %c0_35 = arith.constant 0 : index
    %c0_36 = arith.constant 0 : index
    %c0_37 = arith.constant 0 : index
    %141 = vector.load %arg5[%c0_34, %c0_35, %c0_36, %c0_37] : memref<1x1x8x128xf32, #tpu.memory_space<vmem>>, vector<1x1x8x128xf32>
    tpu.vector_store %arg5[%c0_34, %c0_35, %c0_36, %c0_37], %140 {strides = array<i32>} : memref<1x1x8x128xf32, #tpu.memory_space<vmem>>, vector<1x1x8x128xf32>,
    return
  }
  func.func @transform_0(%arg0: i32, %arg1: i32) -> (i32, i32, i32) {
    %c0_i32 = arith.constant 0 : i32
    %c0_i32_0 = arith.constant 0 : i32
    return %arg0, %arg1, %c0_i32 : i32, i32, i32
  }
  func.func @transform_1(%arg0: i32, %arg1: i32) -> (i32, i32, i32) {
    %c0_i32 = arith.constant 0 : i32
    %c0_i32_0 = arith.constant 0 : i32
    return %arg0, %arg1, %c0_i32 : i32, i32, i32
  }
  func.func @transform_2(%arg0: i32, %arg1: i32) -> (i32, i32, i32) {
    %c0_i32 = arith.constant 0 : i32
    %c0_i32_0 = arith.constant 0 : i32
    return %arg0, %arg1, %c0_i32 : i32, i32, i32
  }
  func.func @transform_3(%arg0: i32, %arg1: i32) -> (i32, i32, i32, i32) {
    %c0_i32 = arith.constant 0 : i32
    %c0_i32_0 = arith.constant 0 : i32
    %c0_i32_1 = arith.constant 0 : i32
    return %arg0, %arg1, %c0_i32, %c0_i32_0 : i32, i32, i32, i32
  }
}

</mosaic_0001>

<bundles_post_ra>
// kernel: tpu_custom_call.1
= control target key start
LH: loop header
LB: loop body
LE: loop exit
PB: predicated region body
PF: predicated region fallthrough
CT: control target
= control target key end

     0   :  { %s1596_s0 = inlined_call_operand.hbm [shape: f32[8,16,16], index: 0, kind: input, shape index: {}]   ;;  %s1597_s1 = inlined_call_operand.hbm [shape: f32[8,16,16], index: 1, kind: input, shape index: {}]   ;;  %s1598_s2 = inlined_call_operand.hbm [shape: f32[8,16,16], index: 2, kind: input, shape index: {}]   ;;  %s1599_s3 = inlined_call_operand.hbm [shape: f32[2,1,8,128], index: 3, kind: output, shape index: {}]  }
   0x1   :  { %1609 = sst [smem:[#allocation15_spill]] %s1597_s1 }
   0x2   :  { %8 = vsyncpa [#allocation3], 0 }
   0x3   :  { %10 = vsyncpa [#allocation3 + $0x1], 0 }
   0x4   :  { %11 = vsyncpa [#allocation6], 0 }
   0x5   :  { %13 = vsyncpa [#allocation6 + $0x1], 0 }
   0x6   :  { %14 = vsyncpa [#allocation4], 0 }
   0x7   :  { %16 = vsyncpa [#allocation4 + $0x1], 0  ;;  %s1130_s12 = smov 0   ;;  %s1132_s13 = smov 0  }
   0x8   :  { %s1134_s14 = smov 0   ;;  %s1136_s15 = smov 0  }
   0x9   :  { %s1138_s16 = smov 0   ;;  %s1140_s17 = smov 0  }
   0xa LB: > { %1610 = sst [smem:[#allocation12_spill]] %s1096_s16  ;;  %s1161_s18 = sadd.s32 4294967295, %s1100_s17   ;;  %s1100_s17 = sphi %s1140_s17, %s22_s17   ;;  %s1096_s16 = sphi %s1138_s16, %s1633_s16   ;;  %s1092_s15 = sphi %s1136_s15, %s1632_s15   ;;  %s1088_s14 = sphi %s1134_s14, %s1636_s14   ;;  %s1084_s13 = sphi %s1132_s13, %s1635_s13   ;;  %s1080_s12 = sphi %s1130_s12, %s1634_s12  }
   0xb   : > { %s794_s19 = sadd.s32 4294967294, %s1100_s17   ;;  %s34_s20 = sadd.s32 1, %s1096_s16 }
   0xc   : > { %s43_s21 = sadd.s32 1, %s1088_s14  ;;  %p36_p0 = scmp.ge.s32.totalorder %s34_s20, 2 }
   0xd   : > { %p50_p1 = scmp.ne.s32.totalorder %s1088_s14, %s1084_s13  ;;  %p51_p2 = scmp.eq.s32.totalorder %s1100_s17, 0 }
   0xe   : > { %p56_p3 = scmp.ne.s32.totalorder %s1084_s13, %s1080_s12  ;;  %s1638_s20 = smov (%p36_p0, %s34_s20), 0 }
   0xf   : > { %1611 = sst [smem:[#allocation13_spill]] %s1638_s20  ;;  %p1173_p4 = por %p51_p2, %p50_p1 }
  0x10   : > { %p57_p5 = scmp.eq.s32.totalorder %s1161_s18, 0  ;;  %s38_s23 = ssub.s32 %s1096_s16, %s1638_s20 }
  0x11   : > { %p138_p6 = scmp.eq.s32.totalorder %s1161_s18, 1  ;;  %p41_p7 = scmp.eq.s32.totalorder %s38_s23, 0 }
  0x12   : > { %p1181_p8 = por %p57_p5, %p56_p3  ;;  %p144_p10 = scmp.eq.s32.totalorder %s794_s19, 1 }
  0x13   : > { %p1185_p9 = por %p138_p6, %p50_p1  ;;  %p870_p13 = scmp.lt.s32.totalorder %s1100_s17, 2 }
  0x14   : > { %s1613_s24 = scalar_select %p1181_p8, 1, 0 }
  0x15   : > { %s1614_s25 = scalar_select %p1185_p9, 1, 0 }
  0x16   : > { %s1190_s26 = scalar_select %p41_p7, %s1088_s14, %s43_s21  }
  0x17   : > { %p1192_p11 = por %p144_p10, %p56_p3  ;;  %s1602_s28 = sand.u32 1, %s1088_s14  }
  0x18   : > { %1615 = sst [smem:[#allocation14_spill]] %s1190_s26  ;;  %s1201_s29 = sshll.u32 %s1602_s28, 6 }
  0x19   : > { %s1616_s27 = scalar_select %p1192_p11, 1, 0 }
  0x1a   : > { %s1204_s30 = sshll.u32 %s1096_s16, 10  ;;  %p1208_p0 = pnand %p870_p13, %p1173_p4 }
  0x1b   : > { %s188_s5 = sand.u32 1, %s1100_s17   ;;  %s1618_s1 = sld [smem:[#allocation15_spill]] }
  0x1c   : > { %s192_s9 = scalar_lea.vmem [#allocation5], %s1201_s29  ;;  %s1224_s11 = scalar_lea.sflag [#allocation6], %s188_s5 }
  0x1d   : > { %s202_s10 = sshll.u32 %s192_s9, 4  ;;  %p1230_p4 = pneg %p1208_p0  ;;  %s1221_s10 = int_to_ptr.vmem [resolvable:$true] %s202_s10 }
  0x21   : > { %s1217_s8 = scalar_lea.hbm %s1618_s1, %s1204_s30  ;;  %s929_s6 = scalar_lea.hbm %s1618_s1, 2048 }
  0x22   : > { %s924_s19 = scalar_lea.hbm %s1217_s8, 1024  ;;  %p930_p7 = scmp.lt.u32.totalorder %s1217_s8, %s1618_s1 }
  0x23   : > { %p925_p3 = scmp.ne.s32.totalorder %s1217_s8, %s924_s19  ;;  %p931_p10 = scmp.lt.u32.totalorder %s929_s6, %s924_s19 }
  0x24   : > { %p933_p12 = scmp.lt.u32.totalorder %s924_s19, %s1217_s8 }
  0x25   : > { %p927_p5 = pnand %p1230_p4, %p925_p3  ;;  %p932_p13 = por %p931_p10, %p930_p7 }
  0x27   : > { %p928_p6 = pneg %p927_p5  ;;  %p934_p1 = por %p933_p12, %p932_p13 }
  0x29   : > { %p935_p2 = pnand %p934_p1, %p928_p6 }
  0x2b   : > { %938 = shalt.err (!%p935_p2)
}
  0x2c   : > { %s939_s5 = scalar_lea.vmem %s1221_s10, 1024  ;;  %s1102_s22 = smov [#allocation5]  }
  0x2d   : > { %p940_p3 = scmp.ne.s32.totalorder %s1221_s10, %s939_s5  ;;  %s944_s23 = sshll.u32 %s1102_s22, 4  ;;  %s945_s23 = int_to_ptr.vmem [resolvable:$false] %s944_s23 }
  0x2e   : > { %s946_s7 = scalar_lea.vmem %s945_s23, 2048  ;;  %p947_p9 = scmp.lt.s32.totalorder %s1221_s10, %s945_s23 }
  0x2f   : > { %p942_p5 = pnand %p940_p3, %p1230_p4  ;;  %p948_p8 = scmp.lt.s32.totalorder %s946_s7, %s939_s5 }
  0x31   : > { %p943_p11 = pneg %p942_p5  ;;  %p949_p7 = por %p948_p8, %p947_p9 }
  0x33   : > { %p950_p10 = pnand %p949_p7, %p943_p11 }
  0x35   : > { %953 = shalt.err (!%p950_p10)
}
  0x36   : > { %s1603_s19 = smov 128   ;;  %s1605_s6 = smov 8  }
  0x37   : > { %862 = dma.hbm_to_vmem [thread:$0]  (!%p1208_p0), %s1217_s8, 1024, %s1221_s10, %s1224_s11, %s1603_s19, %s1603_s19, %s1605_s6  }
  0x38   : > { %p1620_p8 = scmp.lt.s32.totalorder %s1100_s17, 3  ;;  %p1621_p9 = scmp.ge.s32.totalorder %s1100_s17, 1 }
  0x39   : > { %s1269_s23 = scalar_lea.hbm %s1596_s0, %s1204_s30  ;;  %s168_s7 = scalar_lea.vmem [#allocation2], %s1201_s29 }
  0x3a   : > { %p1261_p11 = pnand %p1621_p9, %p1620_p8  ;;  %s178_s28 = sshll.u32 %s168_s7, 4  ;;  %s1272_s28 = int_to_ptr.vmem [resolvable:$true] %s178_s28 }
  0x3b   : > { %s1278_s19 = scalar_lea.hbm %s1598_s2, %s1204_s30  ;;  %s1623_s6 = sand.u32 1, %s1088_s14  }
  0x3c   : > { %s1622_s9 = scalar_select %p1261_p11, 1, 0 }
  0x3d   : > { %s1282_s1 = scalar_lea.sflag [#allocation3], %s1623_s6  ;;  %s954_s20 = scalar_lea.hbm %s1269_s23, 1024 }
  0x3e   : > { %p955_p12 = scmp.ne.s32.totalorder %s1269_s23, %s954_s20  ;;  %s959_s16 = scalar_lea.hbm %s1596_s0, 2048 }
  0x3f   : > { %p960_p6 = scmp.lt.u32.totalorder %s1269_s23, %s1596_s0  ;;  %p961_p13 = scmp.lt.u32.totalorder %s959_s16, %s954_s20 }
  0x40   : > { %p957_p1 = pnand %p955_p12, %p1230_p4  ;;  %p963_p5 = scmp.lt.u32.totalorder %s954_s20, %s1269_s23 }
  0x41   : > { %p962_p3 = por %p961_p13, %p960_p6 }
  0x42   : > { %p958_p2 = pneg %p957_p1 }
  0x43   : > { %p964_p7 = por %p963_p5, %p962_p3 }
  0x45   : > { %p965_p10 = pnand %p964_p7, %p958_p2 }
  0x47   : > { %968 = shalt.err (!%p965_p10)
}
  0x48   : > { %s969_s30 = scalar_lea.vmem %s1272_s28, 1024  ;;  %s1105_s6 = smov [#allocation2]  }
  0x49   : > { %p970_p8 = scmp.ne.s32.totalorder %s1272_s28, %s969_s30  ;;  %s974_s8 = sshll.u32 %s1105_s6, 4  ;;  %s975_s8 = int_to_ptr.vmem [resolvable:$false] %s974_s8 }
  0x4a   : > { %s976_s26 = scalar_lea.vmem %s975_s8, 2048  ;;  %p977_p1 = scmp.lt.s32.totalorder %s1272_s28, %s975_s8 }
  0x4b   : > { %p972_p9 = pnand %p970_p8, %p1230_p4  ;;  %p978_p11 = scmp.lt.s32.totalorder %s976_s26, %s969_s30 }
  0x4d   : > { %p973_p12 = pneg %p972_p9  ;;  %p979_p6 = por %p978_p11, %p977_p1 }
  0x4f   : > { %p980_p13 = pnand %p979_p6, %p973_p12 }
  0x51   : > { %983 = shalt.err (!%p980_p13)
}
  0x52   : > { %s1624_s16 = smov 8   ;;  %s1625_s20 = smov 128  }
  0x53   : > { %859 = dma.hbm_to_vmem [thread:$0]  (!%p1208_p0), %s1269_s23, 1024, %s1272_s28, %s1282_s1, %s1625_s20, %s1625_s20, %s1624_s16  }
  0x54   : > { %s216_s10 = scalar_lea.vmem [#allocation7], %s1201_s29  ;;  %s984_s22 = scalar_lea.hbm %s1278_s19, 1024 }
  0x55   : > { %s226_s5 = sshll.u32 %s216_s10, 4  ;;  %p985_p11 = scmp.ne.s32.totalorder %s1278_s19, %s984_s22  ;;  %s1310_s5 = int_to_ptr.vmem [resolvable:$true] %s226_s5 }
  0x56   : > { %s989_s6 = scalar_lea.hbm %s1598_s2, 2048  ;;  %p990_p5 = scmp.lt.u32.totalorder %s1278_s19, %s1598_s2 }
  0x57   : > { %p987_p2 = pnand %p985_p11, %p1230_p4  ;;  %p991_p7 = scmp.lt.u32.totalorder %s989_s6, %s984_s22 }
  0x58   : > { %p993_p8 = scmp.lt.u32.totalorder %s984_s22, %s1278_s19 }
  0x59   : > { %p988_p3 = pneg %p987_p2  ;;  %p992_p10 = por %p991_p7, %p990_p5 }
  0x5b   : > { %p994_p9 = por %p993_p8, %p992_p10 }
  0x5d   : > { %p995_p12 = pnand %p994_p9, %p988_p3 }
  0x5f   : > { %998 = shalt.err (!%p995_p12)
}
  0x60   : > { %s999_s1 = scalar_lea.vmem %s1310_s5, 1024  ;;  %s1106_s28 = smov [#allocation7]  }
  0x61   : > { %p1000_p1 = scmp.ne.s32.totalorder %s1310_s5, %s999_s1  ;;  %s1004_s29 = sshll.u32 %s1106_s28, 4  ;;  %s1005_s29 = int_to_ptr.vmem [resolvable:$false] %s1004_s29 }
  0x62   : > { %s1006_s23 = scalar_lea.vmem %s1005_s29, 2048  ;;  %p1007_p11 = scmp.lt.s32.totalorder %s1310_s5, %s1005_s29 }
  0x63   : > { %p1002_p6 = pnand %p1000_p1, %p1230_p4  ;;  %p1008_p2 = scmp.lt.s32.totalorder %s1006_s23, %s999_s1 }
  0x65   : > { %p1003_p13 = pneg %p1002_p6  ;;  %p1009_p5 = por %p1008_p2, %p1007_p11 }
  0x67   : > { %p1010_p7 = pnand %p1009_p5, %p1003_p13 }
  0x69   : > { %1013 = shalt.err (!%p1010_p7)
}
  0x6a   : > { %865 = dma.hbm_to_vmem [thread:$0]  (!%p1208_p0), %s1278_s19, 1024, %s1310_s5, %s1224_s11, %s1625_s20, %s1625_s20, %s1624_s16  }
  0x6b   : > { %p1626_p4 = scmp.ne.s32.totalorder %s1622_s9, 0 }
  0x6c   : > { %s1340_s21 = sand.u32 (!%p1626_p4), 1, %s1084_s13   ;;  %p1627_p3 = scmp.ne.s32.totalorder (!%p1626_p4), %s1613_s24, 0 }
  0x6d   : > { %238 = sbr.rel (%p1626_p4) target bundleno = 533 (0x215), region = 32  ;;  %s1343_s10 = sshll.u32 (!%p1626_p4), %s1340_s21, 6 }
  0x6e   : > { %s241_s4 = scalar_lea.sflag (!%p1626_p4), [#allocation3], %s1340_s21  ;;  %s1347_s22 = scalar_lea.vmem (!%p1626_p4), [#allocation2], %s1343_s10 }
  0x74   : > { %1067 = dma.done.wait (%p1627_p3), %s241_s4, 1024  }
  0x75   : > { %1069 = vsyncadd (%p1627_p3), %s241_s4, 4294966272  ;;  %s249_s11 = sand.u32 1, %s1161_s18   ;;  %s1355_s9 = scalar_lea.vmem [#allocation5], %s1343_s10 }
  0x76   : > { %s250_s19 = scalar_lea.sflag [#allocation6], %s249_s11 }
  0x77   : > { %1071 = dma.done.wait (%p1627_p3), %s250_s19, 2048  }
  0x78   : > { %1073 = vsyncadd (%p1627_p3), %s250_s19, 4294965248  ;;  %v324_v0 = vld [vmem:[%s1355_s9] ss:$2 sm:$0xff]  ;;  %v824_v1 = vld [vmem:[%s1355_s9 + $0x1] ss:$2 sm:$0xff]  ;;  %s1107_s18 = smov 127  }
  0x79   : > { %v301_v2 = vld [vmem:[%s1347_s22] ss:$2 sm:$0xff]  ;;  %v1364_v3 = vadd.f32 %v824_v1, %v324_v0  ;;  %v817_v4 = vld [vmem:[%s1347_s22 + $0x1] ss:$2 sm:$0xff]  ;;  %v821_v5 = vld [vmem:[%s1355_s9 + $0x10] ss:$2 sm:$0xff]  ;;  %v1395_v15 = vsub.f32 %v324_v0, %v824_v1 }
  0x7a   : > { %v825_v6 = vld [vmem:[%s1355_s9 + $0x11] ss:$2 sm:$0xff]  ;;  %v1369_v7 = vadd.f32 %v817_v4, %v301_v2  ;;  %v814_v8 = vld [vmem:[%s1347_s22 + $0x10] ss:$2 sm:$0xff]  ;;  %v1387_v13 = vsub.f32 %v301_v2, %v817_v4  ;;  %s1398_s24 = scalar_lea.vmem [#allocation7], %s1343_s10  ;;  %vm478_vm0 = vcmask 121856  }
  0x7b   : > { %v818_v9 = vld [vmem:[%s1347_s22 + $0x11] ss:$2 sm:$0xff]  ;;  %414 = vrot.lane.b32.xlu1 %v1364_v3, %s1107_s18  ;;  %v1375_v10 = vadd.f32 %v825_v6, %v821_v5  ;;  %v1391_v14 = vsub.f32 %v821_v5, %v825_v6  ;;  %v828_v16 = vld [vmem:[%s1398_s24 + $0x10] ss:$2 sm:$0xff]  ;;  %v347_v18 = vld [vmem:[%s1398_s24] ss:$2 sm:$0xff] }
  0x7c   : > { %394 = vrot.lane.b32.xlu0 %v1369_v7, %s1107_s18  ;;  %v1379_v11 = vadd.f32 %v818_v9, %v814_v8  ;;  %v1383_v12 = vsub.f32 %v814_v8, %v818_v9  ;;  %v832_v17 = vld [vmem:[%s1398_s24 + $0x11] ss:$2 sm:$0xff]  ;;  %v831_v19 = vld [vmem:[%s1398_s24 + $0x1] ss:$2 sm:$0xff]  ;;  %v822_v22 = vld [vmem:[%s1355_s9 + $0x20] ss:$2 sm:$0xff] }
  0x7d   : > { %v1406_v20 = vadd.f32 %v832_v17, %v828_v16  ;;  %v1410_v21 = vadd.f32 %v831_v19, %v347_v18  ;;  %v826_v23 = vld [vmem:[%s1355_s9 + $0x21] ss:$2 sm:$0xff]  ;;  %v815_v24 = vld [vmem:[%s1347_s22 + $0x20] ss:$2 sm:$0xff]  ;;  %v1426_v28 = vsub.f32 %v828_v16, %v832_v17  ;;  %v1430_v29 = vsub.f32 %v347_v18, %v831_v19  ;;  %v816_v32 = vld [vmem:[%s1347_s22 + $0x30] ss:$2 sm:$0xff] }
  0x7e   : > { %v819_v25 = vld [vmem:[%s1347_s22 + $0x21] ss:$2 sm:$0xff]  ;;  %v1418_v26 = vadd.f32 %v826_v23, %v822_v22  ;;  %v1434_v30 = vsub.f32 %v822_v22, %v826_v23  ;;  %v820_v33 = vld [vmem:[%s1347_s22 + $0x31] ss:$2 sm:$0xff]  ;;  %v829_v34 = vld [vmem:[%s1398_s24 + $0x20] ss:$2 sm:$0xff] }
  0x7f   : > { %416 = vrot.lane.b32.xlu1 %v1375_v10, %s1107_s18  ;;  %v1422_v27 = vadd.f32 %v819_v25, %v815_v24  ;;  %v1438_v31 = vsub.f32 %v815_v24, %v819_v25  ;;  %v833_v35 = vld [vmem:[%s1398_s24 + $0x21] ss:$2 sm:$0xff]  ;;  %v1446_v36 = vadd.f32 %v820_v33, %v816_v32  ;;  %v823_v38 = vld [vmem:[%s1355_s9 + $0x30] ss:$2 sm:$0xff]  ;;  %v827_v39 = vld [vmem:[%s1355_s9 + $0x31] ss:$2 sm:$0xff]  ;;  %v1468_v43 = vsub.f32 %v816_v32, %v820_v33 }
  0x80   : > { %396 = vrot.lane.b32.xlu0 %v1379_v11, %s1107_s18  ;;  %v1450_v37 = vadd.f32 %v833_v35, %v829_v34  ;;  %v1456_v40 = vsub.f32 %v829_v34, %v833_v35  ;;  %v1460_v41 = vadd.f32 %v827_v39, %v823_v38  ;;  %v1464_v42 = vsub.f32 %v823_v38, %v827_v39  ;;  %v830_v44 = vld [vmem:[%s1398_s24 + $0x30] ss:$2 sm:$0xff]  ;;  %v834_v45 = vld [vmem:[%s1398_s24 + $0x31] ss:$2 sm:$0xff]  ;;  %s813_s16 = sshll.u32 %s1340_s21, 3  ;;  %s837_s7 = sshll.u32 %s1092_s15, 7 }
  0x81   : > { %v1474_v46 = vsub.f32 %v830_v44, %v834_v45  ;;  %v1478_v47 = vadd.f32 %v834_v45, %v830_v44  ;;  %vm634_vm2 = vcmask 114688   ;;  %s294_s20 = scalar_lea.vmem [#allocation8], %s813_s16  ;;  %s1549_s26 = scalar_lea.hbm %s1599_s3, %s837_s7 }
  0x82   : > { %s662_s5 = sshll.u32 %s294_s20, 4  ;;  %s648_s1 = scalar_lea.sflag [#allocation4], %s1340_s21  ;;  %s1544_s5 = int_to_ptr.vmem [resolvable:$true] %s662_s5 }
  0x83   : > { %519 = vrot.lane.b32.xlu1 %v1383_v12, %s1107_s18  ;;  %s1014_s28 = scalar_lea.vmem %s1544_s5, 128  ;;  %p1628_p10 = scmp.ne.s32.totalorder %s1614_s25, 0 }
  0x84   : > { %517 = vrot.lane.b32.xlu0 %v1387_v13, %s1107_s18  ;;  %p1015_p0 = scmp.ne.s32.totalorder %s1544_s5, %s1014_s28  ;;  %s1109_s15 = smov [#allocation8]  }
  0x85   : > { %s1018_s29 = sshll.u32 %s1109_s15, 4  ;;  %s1019_s29 = int_to_ptr.vmem [resolvable:$false] %s1018_s29 }
  0x86   : > { %p1016_p8 = pnand %p1015_p0, %p1628_p10  ;;  %s1020_s23 = scalar_lea.vmem %s1019_s29, 256 }
  0x87   : > { %539 = vrot.lane.b32.xlu1 %v1391_v14, %s1107_s18  ;;  %p1021_p12 = scmp.lt.s32.totalorder %s1544_s5, %s1019_s29  ;;  %p1022_p1 = scmp.lt.s32.totalorder %s1020_s23, %s1014_s28 }
  0x88   : > { %537 = vrot.lane.b32.xlu0 %v1395_v15, %s1107_s18  ;;  %p1017_p9 = pneg %p1016_p8 }
  0x89   : > { %p1023_p6 = por %p1022_p1, %p1021_p12 }
  0x8b   : > { %376 = vrot.lane.b32.xlu1 %v1406_v20, %s1107_s18  ;;  %p1024_p13 = pnand %p1023_p6, %p1017_p9 }
  0x8c   : > { %374 = vrot.lane.b32.xlu0 %v1410_v21, %s1107_s18 }
  0x8f   : > { %418 = vrot.lane.b32.xlu1 %v1418_v26, %s1107_s18 }
  0x90   : > { %398 = vrot.lane.b32.xlu0 %v1422_v27, %s1107_s18 }
  0x93   : > { %499 = vrot.lane.b32.xlu1 %v1426_v28, %s1107_s18 }
  0x94   : > { %497 = vrot.lane.b32.xlu0 %v1430_v29, %s1107_s18 }
  0x97   : > { %541 = vrot.lane.b32.xlu1 %v1434_v30, %s1107_s18 }
  0x98   : > { %521 = vrot.lane.b32.xlu0 %v1438_v31, %s1107_s18 }
  0x9b   : > { %400 = vrot.lane.b32.xlu1 %v1446_v36, %s1107_s18 }
  0x9c   : > { %378 = vrot.lane.b32.xlu0 %v1450_v37, %s1107_s18 }
  0x9f   : > { %501 = vrot.lane.b32.xlu1 %v1456_v40, %s1107_s18 }
  0xa0   : > { %420 = vrot.lane.b32.xlu0 %v1460_v41, %s1107_s18 }
  0xa3   : > { %543 = vrot.lane.b32.xlu1 %v1464_v42, %s1107_s18 }
  0xa4   : > { %523 = vrot.lane.b32.xlu0 %v1468_v43, %s1107_s18 }
  0xa7   : > { %503 = vrot.lane.b32.xlu1 %v1474_v46, %s1107_s18 }
  0xa8   : > { %380 = vrot.lane.b32.xlu0 %v1478_v47, %s1107_s18 }
  0xed   : > { %v415_v48 = vpop.permute.xlu1 %414 }
  0xee   : > { %v395_v49 = vpop.permute.xlu0 %394  ;;  %v426_v62 = vadd.f32 %v415_v48, %v1364_v3  ;;  %v450_v1 = vsub.f32 %v1364_v3, %v415_v48 }
  0xef   : > { %v406_v63 = vadd.f32 %v395_v49, %v1369_v7  ;;  %v446_v2 = vsub.f32 %v1369_v7, %v395_v49 }
  0xf1   : > { %v417_v50 = vpop.permute.xlu1 %416  ;;  %v430_v16 = vmax.f32 %v406_v63, %v426_v62  ;;  %v454_v19 = vmax.f32 %v446_v2, %v450_v1 }
  0xf2   : > { %v397_v51 = vpop.permute.xlu0 %396  ;;  %v427_v57 = vadd.f32 %v417_v50, %v1375_v10  ;;  %v451_v60 = vsub.f32 %v1375_v10, %v417_v50 }
  0xf3   : > { %v407_v58 = vadd.f32 %v397_v51, %v1379_v11  ;;  %v447_v61 = vsub.f32 %v1379_v11, %v397_v51 }
  0xf5   : > { %v520_v52 = vpop.permute.xlu1 %519  ;;  %v431_v6 = vmax.f32 %v407_v58, %v427_v57  ;;  %v455_v9 = vmax.f32 %v447_v61, %v451_v60 }
  0xf6   : > { %v518_v53 = vpop.permute.xlu0 %517  ;;  %v530_v22 = vadd.f32 %v520_v52, %v1383_v12  ;;  %v570_v3 = vsub.f32 %v1383_v12, %v520_v52 }
  0xf7   : > { %v569_v24 = vsub.f32 %v1387_v13, %v518_v53 }
  0xf9   : > { %v540_v54 = vpop.permute.xlu1 %539 }
  0xfa   : > { %v538_v55 = vpop.permute.xlu0 %537  ;;  %v550_v10 = vadd.f32 %v540_v54, %v1391_v14  ;;  %v574_v25 = vsub.f32 %v1391_v14, %v540_v54 }
  0xfb   : > { %v549_v32 = vadd.f32 %v538_v55, %v1395_v15  ;;  %v573_v35 = vsub.f32 %v1395_v15, %v538_v55 }
  0xfc   : > { %v554_v34 = vmax.f32 %v530_v22, %v550_v10  ;;  %v578_v51 = vmax.f32 %v570_v3, %v574_v25 }
  0xfd   : > { %v377_v56 = vpop.permute.xlu1 %376 }
  0xfe   : > { %v375_v59 = vpop.permute.xlu0 %374  ;;  %v387_v0 = vadd.f32 %v377_v56, %v1406_v20  ;;  %v443_v4 = vsub.f32 %v1406_v20, %v377_v56  ;;  %v529_v20 = vadd.f32 %v518_v53, %v1387_v13  ;;  %v577_v53 = vmax.f32 %v569_v24, %v573_v35 }
  0xff   : > { %v386_v11 = vadd.f32 %v375_v59, %v1410_v21  ;;  %v442_v18 = vsub.f32 %v1410_v21, %v375_v59 }
 0x100   : > { %v435_v17 = vsub.f32 %v387_v0, %v431_v6  ;;  %v459_v7 = vsub.f32 %v443_v4, %v455_v9  ;;  %v553_v52 = vmax.f32 %v529_v20, %v549_v32 }
 0x101   : > { %v419_v5 = vpop.permute.xlu1 %418  ;;  %v434_v21 = vsub.f32 %v386_v11, %v430_v16  ;;  %v458_v44 = vsub.f32 %v442_v18, %v454_v19 }
 0x102   : > { %v399_v8 = vpop.permute.xlu0 %398  ;;  %v439_v39 = vand.u32 2147483647, %v435_v17  ;;  %v463_v48 = vand.u32 2147483647, %v459_v7  ;;  %v428_v13 = vadd.f32 %v419_v5, %v1418_v26  ;;  %v452_v54 = vsub.f32 %v1418_v26, %v419_v5 }
 0x103   : > { %v408_v14 = vadd.f32 %v399_v8, %v1422_v27  ;;  %v448_v55 = vsub.f32 %v1422_v27, %v399_v8  ;;  %v462_v57 = vand.u32 2147483647, %v458_v44 }
 0x104   : > { %v467_v60 = vmul.f32 0.045, %v439_v39  ;;  %v471_v61 = vmul.f32 0.105, %v463_v48 }
 0x105   : > { %v500_v23 = vpop.permute.xlu1 %499  ;;  %v432_v62 = vmax.f32 %v408_v14, %v428_v13  ;;  %v456_v27 = vmax.f32 %v448_v55, %v452_v54  ;;  %v470_v16 = vmul.f32 0.105, %v462_v57 }
 0x106   : > { %v498_v33 = vpop.permute.xlu0 %497  ;;  %v510_v38 = vadd.f32 %v500_v23, %v1426_v28  ;;  %v566_v12 = vsub.f32 %v1426_v28, %v500_v23  ;;  %v438_v28 = vand.u32 2147483647, %v434_v21  ;;  %v475_v20 = vadd.f32 %v471_v61, %v467_v60 }
 0x107   : > { %v509_v45 = vadd.f32 %v498_v33, %v1430_v29  ;;  %v565_v49 = vsub.f32 %v1430_v29, %v498_v33 }
 0x108   : > { %v558_v56 = vsub.f32 %v510_v38, %v554_v34  ;;  %v582_v58 = vsub.f32 %v566_v12, %v578_v51  ;;  %v466_v9 = vmul.f32 0.045, %v438_v28 }
 0x109   : > { %v542_v50 = vpop.permute.xlu1 %541  ;;  %v557_v59 = vsub.f32 %v509_v45, %v553_v52  ;;  %v581_v63 = vsub.f32 %v565_v49, %v577_v53 }
 0x10a   : > { %v522_v15 = vpop.permute.xlu0 %521  ;;  %v551_v29 = vadd.f32 %v542_v50, %v1434_v30  ;;  %v575_v1 = vsub.f32 %v1434_v30, %v542_v50  ;;  %v562_v5 = vand.u32 2147483647, %v558_v56  ;;  %v586_v10 = vand.u32 2147483647, %v582_v58 }
 0x10b   : > { %v531_v2 = vadd.f32 %v522_v15, %v1438_v31  ;;  %v571_v26 = vsub.f32 %v1438_v31, %v522_v15  ;;  %v561_v11 = vand.u32 2147483647, %v557_v59  ;;  %v585_v17 = vand.u32 2147483647, %v581_v63 }
 0x10c   : > { %v590_v24 = vmul.f32 0.105, %v562_v5  ;;  %v594_v25 = vmul.f32 0.245, %v586_v10  ;;  %v474_v34 = vadd.f32 %v470_v16, %v466_v9 }
 0x10d   : > { %v401_v0 = vpop.permute.xlu1 %400  ;;  %v555_v30 = vmax.f32 %v531_v2, %v551_v29  ;;  %v579_v3 = vmax.f32 %v571_v26, %v575_v1  ;;  %v589_v32 = vmul.f32 0.105, %v561_v11  ;;  %v593_v35 = vmul.f32 0.245, %v585_v17 }
 0x10e   : > { %v379_v4 = vpop.permute.xlu0 %378  ;;  %v598_v51 = vadd.f32 %v594_v25, %v590_v24  ;;  %v409_v52 = vadd.f32 %v401_v0, %v1446_v36  ;;  %v449_v55 = vsub.f32 %v1446_v36, %v401_v0 }
 0x10f   : > { %v388_v6 = vadd.f32 %v379_v4, %v1450_v37  ;;  %v444_v8 = vsub.f32 %v1450_v37, %v379_v4  ;;  %v597_v54 = vadd.f32 %v593_v35, %v589_v32  ;;  %v616_v32 = vlaneseq }
 0x110   : > { %v602_v4 = vsel %vm478_vm0, %v598_v51, 0.0 }
 0x111   : > { %v436_v18 = vsub.f32 %v388_v6, %v432_v62  ;;  %v460_v19 = vsub.f32 %v444_v8, %v456_v27  ;;  %v502_v22 = vpop.permute.xlu1 %501  ;;  %v601_v27 = vsel %vm478_vm0, %v597_v54, 0.0  ;;  %v480_v6 = vsel %vm478_vm0, %v475_v20, 0.0 }
 0x112   : > { %v511_v7 = vadd.f32 %v502_v22, %v1456_v40  ;;  %v567_v31 = vsub.f32 %v1456_v40, %v502_v22  ;;  %v421_v23 = vpop.permute.xlu0 %420  ;;  %v479_v8 = vsel %vm478_vm0, %v474_v34, 0.0  ;;  %v603_v17 = vadd.f32 %v602_v4, %v601_v27 }
 0x113   : > { %v440_v21 = vand.u32 2147483647, %v436_v18  ;;  %v464_v38 = vand.u32 2147483647, %v460_v19  ;;  %v429_v40 = vadd.f32 %v421_v23, %v1460_v41  ;;  %v453_v14 = vsub.f32 %v1460_v41, %v421_v23 }
 0x114   : > { %v559_v37 = vsub.f32 %v511_v7, %v555_v30  ;;  %v583_v33 = vsub.f32 %v567_v31, %v579_v3  ;;  %v481_v30 = vadd.f32 %v480_v6, %v479_v8 }
 0x115   : > { %v544_v39 = vpop.permute.xlu1 %543  ;;  %v468_v56 = vmul.f32 0.045, %v440_v21  ;;  %v472_v28 = vmul.f32 0.105, %v464_v38  ;;  %v433_v61 = vmax.f32 %v409_v52, %v429_v40  ;;  %v617_v38 = vand.u32 127, %v616_v32 }
 0x116   : > { %v563_v44 = vand.u32 2147483647, %v559_v37  ;;  %v587_v12 = vand.u32 2147483647, %v583_v33  ;;  %v552_v45 = vadd.f32 %v544_v39, %v1464_v42  ;;  %v576_v48 = vsub.f32 %v1464_v42, %v544_v39  ;;  %v524_v13 = vpop.permute.xlu0 %523 }
 0x117   : > { %v532_v49 = vadd.f32 %v524_v13, %v1468_v43  ;;  %v572_v50 = vsub.f32 %v1468_v43, %v524_v13  ;;  %v457_v43 = vmax.f32 %v449_v55, %v453_v14  ;;  %v476_v0 = vadd.f32 %v472_v28, %v468_v56 }
 0x118   : > { %v591_v15 = vmul.f32 0.105, %v563_v44  ;;  %v595_v53 = vmul.f32 0.245, %v587_v12  ;;  %v1108_v52 = vmov 0.0  }
 0x119   : > { %v504_v42 = vpop.permute.xlu1 %503  ;;  %v556_v57 = vmax.f32 %v532_v49, %v552_v45  ;;  %v580_v58 = vmax.f32 %v572_v50, %v576_v48  ;;  %v482_v18 = vsel %vm478_vm0, %v476_v0, 0.0  ;;  %v622_v48 = vand.u32 1, %v617_v38 }
 0x11a   : > { %v512_v59 = vadd.f32 %v504_v42, %v1474_v46  ;;  %v568_v41 = vsub.f32 %v1474_v46, %v504_v42  ;;  %v381_v60 = vpop.permute.xlu0 %380  ;;  %v599_v29 = vadd.f32 %v595_v53, %v591_v15  ;;  %v483_v23 = vadd.f32 %v482_v18, %v481_v30 }
 0x11b   : > { %v389_v62 = vadd.f32 %v381_v60, %v1478_v47  ;;  %v445_v63 = vsub.f32 %v1478_v47, %v381_v60  ;;  %vm630_vm1 = vcmp.eq.s32.totalorder %v622_v48, 0 }
 0x11c   : > { %v560_v1 = vsub.f32 %v512_v59, %v556_v57  ;;  %v584_v36 = vsub.f32 %v568_v41, %v580_v58  ;;  %v604_v47 = vsel %vm478_vm0, %v599_v29, 0.0  ;;  %v835_v15 = vsel %vm630_vm1, 1.0, %v1108_v52 }
 0x11d   : > { %v437_v2 = vsub.f32 %v389_v62, %v433_v61  ;;  %v461_v26 = vsub.f32 %v445_v63, %v457_v43  ;;  %v605_v7 = vadd.f32 %v604_v47, %v603_v17 }
 0x11e   : > { %v564_v5 = vand.u32 2147483647, %v560_v1  ;;  %v588_v46 = vand.u32 2147483647, %v584_v36 }
 0x11f   : > { %v441_v9 = vand.u32 2147483647, %v437_v2  ;;  %v465_v10 = vand.u32 2147483647, %v461_v26 }
 0x120   : > { %v592_v11 = vmul.f32 0.105, %v564_v5  ;;  %v596_v16 = vmul.f32 0.245, %v588_v46 }
 0x121   : > { %v469_v19 = vmul.f32 0.045, %v441_v9  ;;  %v473_v22 = vmul.f32 0.105, %v465_v10 }
 0x122   : > { %v600_v3 = vadd.f32 %v596_v16, %v592_v11 }
 0x123   : > { %v477_v31 = vadd.f32 %v473_v22, %v469_v19 }
 0x124   : > { %v606_v20 = vsel %vm478_vm0, %v600_v3, 0.0 }
 0x125   : > { %v607_v24 = vadd.f32 %v606_v20, %v605_v7  ;;  %v484_v25 = vsel %vm478_vm0, %v477_v31, 0.0 }
 0x126   : > { %v485_v37 = vadd.f32 %v484_v25, %v483_v23 }
 0x127   : > { %v608_v33 = vsel %vm478_vm0, %v607_v24, 0.0 }
 0x128   : > { %v609_v34 = vrot.slane %v608_v33, 4  ;;  %v486_v35 = vsel %vm478_vm0, %v485_v37, 0.0 }
 0x129   : > { %v487_v21 = vrot.slane %v486_v35, 4 }
 0x12a   : > { %v610_v39 = vadd.f32 %v609_v34, %v608_v33 }
 0x12b   : > { %v488_v44 = vadd.f32 %v487_v21, %v486_v35 }
 0x12c   : > { %v611_v12 = vrot.slane %v610_v39, 2 }
 0x12d   : > { %v489_v45 = vrot.slane %v488_v44, 2 }
 0x12e   : > { %v612_v13 = vadd.f32 %v611_v12, %v610_v39 }
 0x12f   : > { %v490_v40 = vadd.f32 %v489_v45, %v488_v44 }
 0x130   : > { %v613_v14 = vrot.slane %v612_v13, 1 }
 0x131   : > { %v491_v49 = vrot.slane %v490_v40, 1 }
 0x132   : > { %v614_v50 = vadd.f32 %v613_v14, %v612_v13 }
 0x133   : > { %v492_v51 = vadd.f32 %v491_v49, %v490_v40 }
 0x135   : > { %v615_v53 = vadd.f32 %v614_v50, %v492_v51 }
 0x137   : > { %v633_v54 = vmul.f32 %v835_v15, %v615_v53 }
 0x139   : > { %v635_v55 = vsel %vm634_vm2, %v633_v54, 0.0 }
 0x13a   : > { %636 = vadd.xlane.f32.xlu0 %v635_v55 }
 0x1c7   : > { %v637_v56 = vpop.xlane.xlu0 %636 }
 0x1c8   : > { %v638_v28 = vrot.slane %v637_v56, 4 }
 0x1ca   : > { %v639_v42 = vadd.f32 %v638_v28, %v637_v56 }
 0x1cc   : > { %v640_v57 = vrot.slane %v639_v42, 2 }
 0x1ce   : > { %v641_v58 = vadd.f32 %v640_v57, %v639_v42 }
 0x1d0   : > { %v642_v59 = vrot.slane %v641_v58, 1 }
 0x1d2   : > { %v643_v41 = vadd.f32 %v642_v59, %v641_v58 }
 0x1d4   : > { %846 = vpush %v643_v41 }
 0x205   : > { %s847_s30 = spop %846 }
 0x206   : > { %v645_v60 = vstv %s847_s30 }
 0x207   : > { %646 = vst [vmem:[%s294_s20] sm:$0xff] %v645_v60 }
 0x208   : > { %1027 = shalt.err (!%p1024_p13)
}
 0x209   : > { %s1028_s21 = scalar_lea.hbm %s1549_s26, 128  ;;  %s1032_s22 = scalar_lea.hbm %s1599_s3, 256 }
 0x20a   : > { %p1029_p11 = scmp.ne.s32.totalorder %s1549_s26, %s1028_s21  ;;  %p1033_p7 = scmp.lt.u32.totalorder %s1549_s26, %s1599_s3 }
 0x20b   : > { %p1034_p4 = scmp.lt.u32.totalorder %s1032_s22, %s1028_s21  ;;  %p1036_p0 = scmp.lt.u32.totalorder %s1028_s21, %s1549_s26 }
 0x20c   : > { %p1030_p2 = pnand %p1029_p11, %p1628_p10 }
 0x20d   : > { %p1035_p3 = por %p1034_p4, %p1033_p7 }
 0x20e   : > { %p1031_p5 = pneg %p1030_p2 }
 0x20f   : > { %p1037_p8 = por %p1036_p0, %p1035_p3 }
 0x211   : > { %p1038_p9 = pnand %p1037_p8, %p1031_p5 }
 0x213   : > { %1041 = shalt.err (!%p1038_p9)
}
 0x214   : > { %854 = dma.vmem_to_hbm [thread:$0]  (%p1628_p10), %s1544_s5, 128, %s1549_s26, %s648_s1  }
 0x215 PF: > { %s674_s9 = sand.u32 1, %s1080_s12   ;;  %p1629_p12 = scmp.ne.s32.totalorder %s1616_s27, 0 }
 0x216   : > { %p1630_p1 = scmp.ge.s32.totalorder %s1100_s17, 2  ;;  %s675_s18 = scalar_lea.sflag [#allocation4], %s674_s9 }
 0x218   : > { %p867_p6 = pnand %p1630_p1, %p1629_p12 }
 0x21a   : > { %1075 = dma.done.wait (!%p867_p6), %s675_s18, 128  }
 0x21b   : > { %1077 = vsyncadd (!%p867_p6), %s675_s18, 4294967168  ;;  %s22_s17 = sadd.s32 1, %s1100_s17   ;;  %s1631_s25 = sld [smem:[#allocation14_spill]] }
 0x21c   : > { %p19_p13 = scmp.ge.s32.totalorder %s22_s17, 4   ;;  %s1632_s15 = sld [smem:[#allocation12_spill]] }
 0x21d   : > { %s1633_s16 = sld [smem:[#allocation13_spill]]  ;;  %s1634_s12 = smov %s1084_s13 }
 0x21e   : > { %s1635_s13 = smov %s1088_s14  ;;  %21 = sbr.rel (!%p19_p13) target bundleno = 10 (0xa), region = 122 }
 0x221   : > { %s1636_s14 = smov %s1631_s25 }
 0x225   :  { %680 = vsyncpa [#allocation3], 1 }
 0x226   :  { %682 = vsyncpa [#allocation3 + $0x1], 1 }
 0x227   :  { %683 = vsyncpa [#allocation6], 1 }
 0x228   :  { %685 = vsyncpa [#allocation6 + $0x1], 1 }
 0x229   :  { %686 = vsyncpa [#allocation4], 1 }
 0x22a   :  { %688 = vsyncpa [#allocation4 + $0x1], 1 }

// kernel: tpu_custom_call.1
= control target key start
LH: loop header
LB: loop body
LE: loop exit
PB: predicated region body
PF: predicated region fallthrough
CT: control target
= control target key end

     0   :  { %s2210_s0 = inlined_call_operand.hbm [shape: f32[8,16,16], index: 0, kind: input, shape index: {}]   ;;  %s2211_s1 = inlined_call_operand.hbm [shape: f32[8,16,16], index: 1, kind: input, shape index: {}]   ;;  %s2212_s2 = inlined_call_operand.hbm [shape: f32[8,16,16], index: 2, kind: input, shape index: {}]   ;;  %s2213_s3 = inlined_call_operand.hbm [shape: f32[2,1,8,128], index: 3, kind: output, shape index: {}]  }
   0x1   :  { %2243 = sst [smem:[#allocation25_spill]] %s2211_s1 }
   0x2   :  { %8 = vsyncpa [#allocation3], 0 }
   0x3   :  { %10 = vsyncpa [#allocation3 + $0x1], 0 }
   0x4   :  { %11 = vsyncpa [#allocation6], 0 }
   0x5   :  { %13 = vsyncpa [#allocation6 + $0x1], 0 }
   0x6   :  { %14 = vsyncpa [#allocation4], 0 }
   0x7   :  { %16 = vsyncpa [#allocation4 + $0x1], 0  ;;  %s1471_s12 = smov 0   ;;  %s1473_s13 = smov 0  }
   0x8   :  { %s1475_s14 = smov 0   ;;  %s1477_s15 = smov 0  }
   0x9   :  { %s1479_s16 = smov 0   ;;  %s1481_s17 = smov 0  }
   0xa LB: > { %2244 = sst [smem:[#allocation12_spill]] %s1437_s16  ;;  %s1502_s18 = sadd.s32 4294967295, %s1441_s17   ;;  %s1441_s17 = sphi %s1481_s17, %s22_s17   ;;  %s1437_s16 = sphi %s1479_s16, %s2291_s16   ;;  %s1433_s15 = sphi %s1477_s15, %s2290_s15   ;;  %s1429_s14 = sphi %s1475_s14, %s2294_s14   ;;  %s1425_s13 = sphi %s1473_s13, %s2293_s13   ;;  %s1421_s12 = sphi %s1471_s12, %s2292_s12  }
   0xb   : > { %s1154_s19 = sadd.s32 4294967294, %s1441_s17   ;;  %s34_s20 = sadd.s32 1, %s1437_s16 }
   0xc   : > { %s43_s21 = sadd.s32 1, %s1429_s14  ;;  %p36_p0 = scmp.ge.s32.totalorder %s34_s20, 2 }
   0xd   : > { %p50_p1 = scmp.ne.s32.totalorder %s1429_s14, %s1425_s13  ;;  %p51_p2 = scmp.eq.s32.totalorder %s1441_s17, 0 }
   0xe   : > { %p56_p3 = scmp.ne.s32.totalorder %s1425_s13, %s1421_s12  ;;  %s2296_s20 = smov (%p36_p0, %s34_s20), 0 }
   0xf   : > { %2245 = sst [smem:[#allocation13_spill]] %s2296_s20  ;;  %p1514_p4 = por %p51_p2, %p50_p1 }
  0x10   : > { %p57_p5 = scmp.eq.s32.totalorder %s1502_s18, 0  ;;  %s38_s23 = ssub.s32 %s1437_s16, %s2296_s20 }
  0x11   : > { %p138_p6 = scmp.eq.s32.totalorder %s1502_s18, 1  ;;  %p41_p7 = scmp.eq.s32.totalorder %s38_s23, 0 }
  0x12   : > { %p1522_p8 = por %p57_p5, %p56_p3  ;;  %p144_p10 = scmp.eq.s32.totalorder %s1154_s19, 1 }
  0x13   : > { %p1526_p9 = por %p138_p6, %p50_p1  ;;  %p1211_p13 = scmp.lt.s32.totalorder %s1441_s17, 2 }
  0x14   : > { %s2247_s24 = scalar_select %p1522_p8, 1, 0 }
  0x15   : > { %s2248_s25 = scalar_select %p1526_p9, 1, 0 }
  0x16   : > { %s1531_s26 = scalar_select %p41_p7, %s1429_s14, %s43_s21  }
  0x17   : > { %p1533_p11 = por %p144_p10, %p56_p3  ;;  %s2216_s28 = sand.u32 1, %s1429_s14  }
  0x18   : > { %2249 = sst [smem:[#allocation14_spill]] %s1531_s26  ;;  %s1542_s29 = sshll.u32 %s2216_s28, 6 }
  0x19   : > { %s2250_s27 = scalar_select %p1533_p11, 1, 0 }
  0x1a   : > { %s1545_s30 = sshll.u32 %s1437_s16, 10  ;;  %p1549_p0 = pnand %p1211_p13, %p1514_p4 }
  0x1b   : > { %s188_s5 = sand.u32 1, %s1441_s17   ;;  %s2252_s1 = sld [smem:[#allocation25_spill]] }
  0x1c   : > { %s192_s9 = scalar_lea.vmem [#allocation5], %s1542_s29  ;;  %s1565_s11 = scalar_lea.sflag [#allocation6], %s188_s5 }
  0x1d   : > { %s202_s10 = sshll.u32 %s192_s9, 4  ;;  %p1571_p4 = pneg %p1549_p0  ;;  %s1562_s10 = int_to_ptr.vmem [resolvable:$true] %s202_s10 }
  0x21   : > { %s1558_s8 = scalar_lea.hbm %s2252_s1, %s1545_s30  ;;  %s1270_s6 = scalar_lea.hbm %s2252_s1, 2048 }
  0x22   : > { %s1265_s19 = scalar_lea.hbm %s1558_s8, 1024  ;;  %p1271_p7 = scmp.lt.u32.totalorder %s1558_s8, %s2252_s1 }
  0x23   : > { %p1266_p3 = scmp.ne.s32.totalorder %s1558_s8, %s1265_s19  ;;  %p1272_p10 = scmp.lt.u32.totalorder %s1270_s6, %s1265_s19 }
  0x24   : > { %p1274_p12 = scmp.lt.u32.totalorder %s1265_s19, %s1558_s8 }
  0x25   : > { %p1268_p5 = pnand %p1571_p4, %p1266_p3  ;;  %p1273_p13 = por %p1272_p10, %p1271_p7 }
  0x27   : > { %p1269_p6 = pneg %p1268_p5  ;;  %p1275_p1 = por %p1274_p12, %p1273_p13 }
  0x29   : > { %p1276_p2 = pnand %p1275_p1, %p1269_p6 }
  0x2b   : > { %1279 = shalt.err (!%p1276_p2)
}
  0x2c   : > { %s1280_s5 = scalar_lea.vmem %s1562_s10, 1024  ;;  %s1443_s22 = smov [#allocation5]  }
  0x2d   : > { %p1281_p3 = scmp.ne.s32.totalorder %s1562_s10, %s1280_s5  ;;  %s1285_s23 = sshll.u32 %s1443_s22, 4  ;;  %s1286_s23 = int_to_ptr.vmem [resolvable:$false] %s1285_s23 }
  0x2e   : > { %s1287_s7 = scalar_lea.vmem %s1286_s23, 2048  ;;  %p1288_p9 = scmp.lt.s32.totalorder %s1562_s10, %s1286_s23 }
  0x2f   : > { %p1283_p5 = pnand %p1281_p3, %p1571_p4  ;;  %p1289_p8 = scmp.lt.s32.totalorder %s1287_s7, %s1280_s5 }
  0x31   : > { %p1284_p11 = pneg %p1283_p5  ;;  %p1290_p7 = por %p1289_p8, %p1288_p9 }
  0x33   : > { %p1291_p10 = pnand %p1290_p7, %p1284_p11 }
  0x35   : > { %1294 = shalt.err (!%p1291_p10)
}
  0x36   : > { %s2217_s19 = smov 128   ;;  %s2219_s6 = smov 8  }
  0x37   : > { %1203 = dma.hbm_to_vmem [thread:$0]  (!%p1549_p0), %s1558_s8, 1024, %s1562_s10, %s1565_s11, %s2217_s19, %s2217_s19, %s2219_s6  }
  0x38   : > { %p2254_p8 = scmp.lt.s32.totalorder %s1441_s17, 3  ;;  %p2255_p9 = scmp.ge.s32.totalorder %s1441_s17, 1 }
  0x39   : > { %s1610_s23 = scalar_lea.hbm %s2210_s0, %s1545_s30  ;;  %s168_s7 = scalar_lea.vmem [#allocation2], %s1542_s29 }
  0x3a   : > { %p1602_p11 = pnand %p2255_p9, %p2254_p8  ;;  %s178_s28 = sshll.u32 %s168_s7, 4  ;;  %s1613_s28 = int_to_ptr.vmem [resolvable:$true] %s178_s28 }
  0x3b   : > { %s1619_s19 = scalar_lea.hbm %s2212_s2, %s1545_s30  ;;  %s2257_s6 = sand.u32 1, %s1429_s14  }
  0x3c   : > { %s2256_s9 = scalar_select %p1602_p11, 1, 0 }
  0x3d   : > { %s1623_s1 = scalar_lea.sflag [#allocation3], %s2257_s6  ;;  %s1295_s20 = scalar_lea.hbm %s1610_s23, 1024 }
  0x3e   : > { %p1296_p12 = scmp.ne.s32.totalorder %s1610_s23, %s1295_s20  ;;  %s1300_s16 = scalar_lea.hbm %s2210_s0, 2048 }
  0x3f   : > { %p1301_p6 = scmp.lt.u32.totalorder %s1610_s23, %s2210_s0  ;;  %p1302_p13 = scmp.lt.u32.totalorder %s1300_s16, %s1295_s20 }
  0x40   : > { %p1298_p1 = pnand %p1296_p12, %p1571_p4  ;;  %p1304_p5 = scmp.lt.u32.totalorder %s1295_s20, %s1610_s23 }
  0x41   : > { %p1303_p3 = por %p1302_p13, %p1301_p6 }
  0x42   : > { %p1299_p2 = pneg %p1298_p1 }
  0x43   : > { %p1305_p7 = por %p1304_p5, %p1303_p3 }
  0x45   : > { %p1306_p10 = pnand %p1305_p7, %p1299_p2 }
  0x47   : > { %1309 = shalt.err (!%p1306_p10)
}
  0x48   : > { %s1310_s30 = scalar_lea.vmem %s1613_s28, 1024  ;;  %s1446_s6 = smov [#allocation2]  }
  0x49   : > { %p1311_p8 = scmp.ne.s32.totalorder %s1613_s28, %s1310_s30  ;;  %s1315_s8 = sshll.u32 %s1446_s6, 4  ;;  %s1316_s8 = int_to_ptr.vmem [resolvable:$false] %s1315_s8 }
  0x4a   : > { %s1317_s26 = scalar_lea.vmem %s1316_s8, 2048  ;;  %p1318_p1 = scmp.lt.s32.totalorder %s1613_s28, %s1316_s8 }
  0x4b   : > { %p1313_p9 = pnand %p1311_p8, %p1571_p4  ;;  %p1319_p11 = scmp.lt.s32.totalorder %s1317_s26, %s1310_s30 }
  0x4d   : > { %p1314_p12 = pneg %p1313_p9  ;;  %p1320_p6 = por %p1319_p11, %p1318_p1 }
  0x4f   : > { %p1321_p13 = pnand %p1320_p6, %p1314_p12 }
  0x51   : > { %1324 = shalt.err (!%p1321_p13)
}
  0x52   : > { %s2258_s16 = smov 8   ;;  %s2259_s20 = smov 128  }
  0x53   : > { %1200 = dma.hbm_to_vmem [thread:$0]  (!%p1549_p0), %s1610_s23, 1024, %s1613_s28, %s1623_s1, %s2259_s20, %s2259_s20, %s2258_s16  }
  0x54   : > { %s216_s10 = scalar_lea.vmem [#allocation7], %s1542_s29  ;;  %s1325_s22 = scalar_lea.hbm %s1619_s19, 1024 }
  0x55   : > { %s226_s5 = sshll.u32 %s216_s10, 4  ;;  %p1326_p11 = scmp.ne.s32.totalorder %s1619_s19, %s1325_s22  ;;  %s1651_s5 = int_to_ptr.vmem [resolvable:$true] %s226_s5 }
  0x56   : > { %s1330_s6 = scalar_lea.hbm %s2212_s2, 2048  ;;  %p1331_p5 = scmp.lt.u32.totalorder %s1619_s19, %s2212_s2 }
  0x57   : > { %p1328_p2 = pnand %p1326_p11, %p1571_p4  ;;  %p1332_p7 = scmp.lt.u32.totalorder %s1330_s6, %s1325_s22 }
  0x58   : > { %p1334_p8 = scmp.lt.u32.totalorder %s1325_s22, %s1619_s19 }
  0x59   : > { %p1329_p3 = pneg %p1328_p2  ;;  %p1333_p10 = por %p1332_p7, %p1331_p5 }
  0x5b   : > { %p1335_p9 = por %p1334_p8, %p1333_p10 }
  0x5d   : > { %p1336_p12 = pnand %p1335_p9, %p1329_p3 }
  0x5f   : > { %1339 = shalt.err (!%p1336_p12)
}
  0x60   : > { %s1340_s1 = scalar_lea.vmem %s1651_s5, 1024  ;;  %s1447_s28 = smov [#allocation7]  }
  0x61   : > { %p1341_p1 = scmp.ne.s32.totalorder %s1651_s5, %s1340_s1  ;;  %s1345_s29 = sshll.u32 %s1447_s28, 4  ;;  %s1346_s29 = int_to_ptr.vmem [resolvable:$false] %s1345_s29 }
  0x62   : > { %s1347_s23 = scalar_lea.vmem %s1346_s29, 2048  ;;  %p1348_p11 = scmp.lt.s32.totalorder %s1651_s5, %s1346_s29 }
  0x63   : > { %p1343_p6 = pnand %p1341_p1, %p1571_p4  ;;  %p1349_p2 = scmp.lt.s32.totalorder %s1347_s23, %s1340_s1 }
  0x65   : > { %p1344_p13 = pneg %p1343_p6  ;;  %p1350_p5 = por %p1349_p2, %p1348_p11 }
  0x67   : > { %p1351_p7 = pnand %p1350_p5, %p1344_p13 }
  0x69   : > { %1354 = shalt.err (!%p1351_p7)
}
  0x6a   : > { %1206 = dma.hbm_to_vmem [thread:$0]  (!%p1549_p0), %s1619_s19, 1024, %s1651_s5, %s1565_s11, %s2259_s20, %s2259_s20, %s2258_s16  }
  0x6b   : > { %p2260_p4 = scmp.ne.s32.totalorder %s2256_s9, 0 }
  0x6d   : > { %238 = sbr.rel (%p2260_p4) target bundleno = 591 (0x24f), region = 32 }
  0x74   : > { %s1681_s21 = sand.u32 1, %s1425_s13   ;;  %p2261_p3 = scmp.ne.s32.totalorder %s2247_s24, 0 }
  0x75   : > { %s1684_s10 = sshll.u32 %s1681_s21, 6  ;;  %s241_s4 = scalar_lea.sflag [#allocation3], %s1681_s21 }
  0x76   : > { %s1688_s22 = scalar_lea.vmem [#allocation2], %s1684_s10 }
  0x77   : > { %1408 = dma.done.wait (%p2261_p3), %s241_s4, 1024  }
  0x78   : > { %1410 = vsyncadd (%p2261_p3), %s241_s4, 4294966272  ;;  %s249_s11 = sand.u32 1, %s1502_s18   ;;  %s1696_s9 = scalar_lea.vmem [#allocation5], %s1684_s10 }
  0x79   : > { %s250_s19 = scalar_lea.sflag [#allocation6], %s249_s11 }
  0x7a   : > { %1412 = dma.done.wait (%p2261_p3), %s250_s19, 2048  }
  0x7b   : > { %1414 = vsyncadd (%p2261_p3), %s250_s19, 4294965248  ;;  %v304_v0 = vld [vmem:[%s1688_s22 + $0x18] sm:$0xff]  ;;  %v302_v1 = vld [vmem:[%s1688_s22 + $0x8] sm:$0xff]  ;;  %vm317_vm0 = vcmask 1046528   ;;  %s1448_s18 = smov 127   ;;  %s1759_s24 = scalar_lea.vmem [#allocation7], %s1684_s10 }
  0x7c   : > { %v355_v2 = vld [vmem:[%s1696_s9 + $0x8] sm:$0xff]  ;;  %v322_v3 = vrot.slane %v304_v0, 1  ;;  %v319_v4 = vrot.slane %v302_v1, 1  ;;  %v301_v6 = vld [vmem:[%s1688_s22] sm:$0xff]  ;;  %v357_v9 = vld [vmem:[%s1696_s9 + $0x18] sm:$0xff]  ;;  %vm682_vm1 = vcmask 120832  }
  0x7d   : > { %v371_v5 = vrot.slane %v355_v2, 1  ;;  %v354_v7 = vld [vmem:[%s1696_s9] sm:$0xff]  ;;  %v318_v8 = vrot.slane %v301_v6, 1  ;;  %v303_v13 = vld [vmem:[%s1688_s22 + $0x10] sm:$0xff]  ;;  %v374_v18 = vrot.slane %v357_v9, 1  ;;  %v407_v32 = vld [vmem:[%s1759_s24 + $0x8] sm:$0xff] }
  0x7e   : > { %v370_v10 = vrot.slane %v354_v7, 1  ;;  %v1708_v11 = vadd.f32 %v322_v3, %v304_v0  ;;  %v1710_v12 = vadd.f32 %v319_v4, %v302_v1  ;;  %v356_v14 = vld [vmem:[%s1696_s9 + $0x10] sm:$0xff]  ;;  %v321_v20 = vrot.slane %v303_v13, 1  ;;  %v406_v33 = vld [vmem:[%s1759_s24] sm:$0xff]  ;;  %v409_v38 = vld [vmem:[%s1759_s24 + $0x18] sm:$0xff]  ;;  %s1173_s16 = sshll.u32 %s1681_s21, 3 }
  0x7f   : > { %v320_v15 = vsel %vm317_vm0, %v318_v8, %v319_v4  ;;  %v1719_v16 = vadd.f32 %v371_v5, %v355_v2  ;;  %v373_v21 = vrot.slane %v356_v14, 1  ;;  %v1728_v22 = vadd.f32 %v374_v18, %v357_v9  ;;  %v408_v39 = vld [vmem:[%s1759_s24 + $0x10] sm:$0xff]  ;;  %v306_v45 = vld [vmem:[%s1688_s22 + $0x28] sm:$0xff]  ;;  %v305_v46 = vld [vmem:[%s1688_s22 + $0x20] sm:$0xff]  ;;  %s294_s20 = scalar_lea.vmem [#allocation8], %s1173_s16  ;;  %s1178_s7 = sshll.u32 %s1433_s15, 7 }
  0x80   : > { %512 = vrot.lane.b32.xlu1 %v1708_v11, %s1448_s18  ;;  %508 = vrot.lane.b32.xlu0 %v1710_v12, %s1448_s18  ;;  %v1721_v17 = vadd.f32 %v320_v15, %v301_v6  ;;  %v372_v19 = vsel %vm317_vm0, %v370_v10, %v371_v5  ;;  %v323_v24 = vsel %vm317_vm0, %v321_v20, %v322_v3  ;;  %v423_v36 = vrot.slane %v407_v32, 1  ;;  %v359_v52 = vld [vmem:[%s1696_s9 + $0x28] sm:$0xff]  ;;  %v358_v53 = vld [vmem:[%s1696_s9 + $0x20] sm:$0xff]  ;;  %s1022_s5 = sshll.u32 %s294_s20, 4  ;;  %s2163_s26 = scalar_lea.hbm %s2213_s3, %s1178_s7  ;;  %s2158_s5 = int_to_ptr.vmem [resolvable:$true] %s1022_s5 }
  0x81   : > { %v1730_v23 = vadd.f32 %v372_v19, %v354_v7  ;;  %v375_v25 = vsel %vm317_vm0, %v373_v21, %v374_v18  ;;  %v1738_v26 = vadd.f32 %v323_v24, %v303_v13  ;;  %v1746_v28 = vsub.f32 %v302_v1, %v319_v4  ;;  %v411_v4 = vld [vmem:[%s1759_s24 + $0x28] sm:$0xff]  ;;  %v308_v10 = vld [vmem:[%s1688_s22 + $0x38] sm:$0xff]  ;;  %s1008_s1 = scalar_lea.sflag [#allocation4], %s1681_s21  ;;  %s1355_s28 = scalar_lea.vmem %s2158_s5, 128 }
  0x82   : > { %v1740_v27 = vadd.f32 %v375_v25, %v356_v14  ;;  %v1748_v29 = vsub.f32 %v301_v6, %v320_v15  ;;  %v1754_v30 = vsub.f32 %v304_v0, %v322_v3  ;;  %v1756_v31 = vsub.f32 %v303_v13, %v323_v24  ;;  %v307_v13 = vld [vmem:[%s1688_s22 + $0x30] sm:$0xff]  ;;  %v361_v21 = vld [vmem:[%s1696_s9 + $0x38] sm:$0xff]  ;;  %p1356_p0 = scmp.ne.s32.totalorder %s2158_s5, %s1355_s28  ;;  %p2286_p10 = scmp.ne.s32.totalorder %s2248_s25, 0 }
  0x83   : > { %v1767_v34 = vsub.f32 %v355_v2, %v371_v5  ;;  %v1769_v35 = vsub.f32 %v354_v7, %v372_v19  ;;  %v422_v37 = vrot.slane %v406_v33, 1  ;;  %v1777_v40 = vsub.f32 %v357_v9, %v374_v18  ;;  %v410_v5 = vld [vmem:[%s1759_s24 + $0x20] sm:$0xff]  ;;  %v360_v24 = vld [vmem:[%s1696_s9 + $0x30] sm:$0xff]  ;;  %s1450_s15 = smov [#allocation8]  }
  0x84   : > { %548 = vrot.lane.b32.xlu1 %v1719_v16, %s1448_s18  ;;  %506 = vrot.lane.b32.xlu0 %v1721_v17, %s1448_s18  ;;  %v1779_v41 = vsub.f32 %v356_v14, %v375_v25  ;;  %v426_v43 = vrot.slane %v409_v38, 1  ;;  %v425_v44 = vrot.slane %v408_v39, 1  ;;  %v1788_v47 = vadd.f32 %v423_v36, %v407_v32  ;;  %p1357_p8 = pnand %p1356_p0, %p2286_p10  ;;  %s1359_s29 = sshll.u32 %s1450_s15, 4  ;;  %s1360_s29 = int_to_ptr.vmem [resolvable:$false] %s1359_s29 }
  0x85   : > { %v424_v42 = vsel %vm317_vm0, %v422_v37, %v423_v36  ;;  %v325_v50 = vrot.slane %v306_v45, 1  ;;  %v324_v51 = vrot.slane %v305_v46, 1  ;;  %v377_v57 = vrot.slane %v359_v52, 1  ;;  %s1361_s23 = scalar_lea.vmem %s1360_s29, 256  ;;  %p1362_p12 = scmp.lt.s32.totalorder %s2158_s5, %s1360_s29 }
  0x86   : > { %v1790_v48 = vadd.f32 %v424_v42, %v406_v33  ;;  %v427_v49 = vsel %vm317_vm0, %v425_v44, %v426_v43  ;;  %v1799_v54 = vadd.f32 %v426_v43, %v409_v38  ;;  %v376_v58 = vrot.slane %v358_v53, 1  ;;  %p1358_p9 = pneg %p1357_p8  ;;  %p1363_p1 = scmp.lt.s32.totalorder %s1361_s23, %s1355_s28 }
  0x87   : > { %v1801_v55 = vadd.f32 %v427_v49, %v408_v39  ;;  %v326_v56 = vsel %vm317_vm0, %v324_v51, %v325_v50  ;;  %v1808_v59 = vadd.f32 %v325_v50, %v306_v45  ;;  %v1817_v62 = vadd.f32 %v377_v57, %v359_v52 }
  0x88   : > { %552 = vrot.lane.b32.xlu1 %v1728_v22, %s1448_s18  ;;  %546 = vrot.lane.b32.xlu0 %v1730_v23, %s1448_s18  ;;  %v1810_v60 = vadd.f32 %v326_v56, %v305_v46  ;;  %v378_v61 = vsel %vm317_vm0, %v376_v58, %v377_v57  ;;  %v1825_v0 = vsub.f32 %v407_v32, %v423_v36  ;;  %v429_v8 = vrot.slane %v411_v4, 1  ;;  %p1364_p6 = por %p1363_p1, %p1362_p12 }
  0x89   : > { %v1819_v63 = vadd.f32 %v378_v61, %v358_v53  ;;  %v1827_v1 = vsub.f32 %v406_v33, %v424_v42  ;;  %v1833_v2 = vsub.f32 %v409_v38, %v426_v43  ;;  %v1835_v3 = vsub.f32 %v408_v39, %v427_v49  ;;  %v413_v49 = vld [vmem:[%s1759_s24 + $0x38] sm:$0xff] }
  0x8a   : > { %v1843_v6 = vsub.f32 %v306_v45, %v325_v50  ;;  %v1845_v7 = vsub.f32 %v305_v46, %v326_v56  ;;  %v428_v9 = vrot.slane %v410_v5, 1  ;;  %v1853_v14 = vsub.f32 %v359_v52, %v377_v57  ;;  %v412_v50 = vld [vmem:[%s1759_s24 + $0x30] sm:$0xff]  ;;  %p1365_p13 = pnand %p1364_p6, %p1358_p9 }
  0x8b   : > { %v1855_v15 = vsub.f32 %v358_v53, %v378_v61  ;;  %v328_v19 = vrot.slane %v308_v10, 1  ;;  %v327_v20 = vrot.slane %v307_v13, 1  ;;  %v1864_v25 = vadd.f32 %v429_v8, %v411_v4 }
  0x8c   : > { %510 = vrot.lane.b32.xlu1 %v1738_v26, %s1448_s18  ;;  %550 = vrot.lane.b32.xlu0 %v1740_v27, %s1448_s18  ;;  %v430_v18 = vsel %vm317_vm0, %v428_v9, %v429_v8  ;;  %v380_v36 = vrot.slane %v361_v21, 1  ;;  %v379_v37 = vrot.slane %v360_v24, 1  ;;  %v1890_v45 = vsub.f32 %v411_v4, %v429_v8 }
  0x8d   : > { %v1866_v32 = vadd.f32 %v430_v18, %v410_v5  ;;  %v329_v33 = vsel %vm317_vm0, %v327_v20, %v328_v19  ;;  %v1873_v38 = vadd.f32 %v328_v19, %v308_v10  ;;  %v1892_v46 = vsub.f32 %v410_v5, %v430_v18 }
  0x8e   : > { %v1875_v39 = vadd.f32 %v329_v33, %v307_v13  ;;  %v381_v42 = vsel %vm317_vm0, %v379_v37, %v380_v36  ;;  %v1882_v43 = vadd.f32 %v380_v36, %v361_v21  ;;  %v1900_v51 = vsub.f32 %v308_v10, %v328_v19 }
  0x8f   : > { %2262 = vst [vmem:[#allocation15_spill] sm:$0xff] %v1873_v38  ;;  %v1884_v44 = vadd.f32 %v381_v42, %v360_v24  ;;  %v1902_v52 = vsub.f32 %v307_v13, %v329_v33  ;;  %v432_v53 = vrot.slane %v413_v49, 1  ;;  %v431_v56 = vrot.slane %v412_v50, 1 }
  0x90   : > { %784 = vrot.lane.b32.xlu1 %v1746_v28, %s1448_s18  ;;  %782 = vrot.lane.b32.xlu0 %v1748_v29, %s1448_s18  ;;  %2263 = vst [vmem:[#allocation16_spill] sm:$0xff] %v1875_v39  ;;  %2264 = vst [vmem:[#allocation17_spill] sm:$0xff] %v1900_v51  ;;  %v1908_v57 = vsub.f32 %v361_v21, %v380_v36  ;;  %v1910_v58 = vsub.f32 %v360_v24, %v381_v42  ;;  %vm674_vm2 = vcmask 121856   ;;  %vm994_vm6 = vcmask 114688  }
  0x91   : > { %2265 = vst [vmem:[#allocation18_spill] sm:$0xff] %v1902_v52  ;;  %v433_v61 = vsel %vm317_vm0, %v431_v56, %v432_v53  ;;  %v1917_v4 = vadd.f32 %v432_v53, %v413_v49  ;;  %v1925_v8 = vsub.f32 %v413_v49, %v432_v53 }
  0x92   : > { %2266 = vst [vmem:[#allocation19_spill] sm:$0xff] %v1908_v57  ;;  %2267 = vst [vmem:[#allocation20_spill] sm:$0xff] %v1910_v58  ;;  %v1919_v5 = vadd.f32 %v433_v61, %v412_v50  ;;  %v1927_v9 = vsub.f32 %v412_v50, %v433_v61 }
  0x93   : > { %2268 = vst [vmem:[#allocation21_spill] sm:$0xff] %v1917_v4  ;;  %2270 = vst [vmem:[#allocation23_spill] sm:$0xff] %v1925_v8 }
  0x94   : > { %788 = vrot.lane.b32.xlu1 %v1754_v30, %s1448_s18  ;;  %786 = vrot.lane.b32.xlu0 %v1756_v31, %s1448_s18  ;;  %2269 = vst [vmem:[#allocation22_spill] sm:$0xff] %v1919_v5  ;;  %2271 = vst [vmem:[#allocation24_spill] sm:$0xff] %v1927_v9 }
  0x98   : > { %824 = vrot.lane.b32.xlu1 %v1767_v34, %s1448_s18  ;;  %822 = vrot.lane.b32.xlu0 %v1769_v35, %s1448_s18 }
  0x9c   : > { %828 = vrot.lane.b32.xlu1 %v1777_v40, %s1448_s18  ;;  %826 = vrot.lane.b32.xlu0 %v1779_v41, %s1448_s18 }
  0xa0   : > { %468 = vrot.lane.b32.xlu1 %v1788_v47, %s1448_s18  ;;  %466 = vrot.lane.b32.xlu0 %v1790_v48, %s1448_s18 }
  0xa4   : > { %472 = vrot.lane.b32.xlu1 %v1799_v54, %s1448_s18  ;;  %470 = vrot.lane.b32.xlu0 %v1801_v55, %s1448_s18 }
  0xa8   : > { %516 = vrot.lane.b32.xlu1 %v1808_v59, %s1448_s18  ;;  %514 = vrot.lane.b32.xlu0 %v1810_v60, %s1448_s18 }
  0xac   : > { %556 = vrot.lane.b32.xlu1 %v1817_v62, %s1448_s18  ;;  %554 = vrot.lane.b32.xlu0 %v1819_v63, %s1448_s18 }
  0xb0   : > { %744 = vrot.lane.b32.xlu1 %v1825_v0, %s1448_s18  ;;  %742 = vrot.lane.b32.xlu0 %v1827_v1, %s1448_s18 }
  0xb4   : > { %748 = vrot.lane.b32.xlu1 %v1833_v2, %s1448_s18  ;;  %746 = vrot.lane.b32.xlu0 %v1835_v3, %s1448_s18 }
  0xb8   : > { %792 = vrot.lane.b32.xlu1 %v1843_v6, %s1448_s18  ;;  %790 = vrot.lane.b32.xlu0 %v1845_v7, %s1448_s18 }
  0xbc   : > { %832 = vrot.lane.b32.xlu1 %v1853_v14, %s1448_s18  ;;  %830 = vrot.lane.b32.xlu0 %v1855_v15, %s1448_s18 }
  0xc0   : > { %476 = vrot.lane.b32.xlu1 %v1864_v25, %s1448_s18  ;;  %474 = vrot.lane.b32.xlu0 %v1866_v32, %s1448_s18 }
  0xc4   : > { %520 = vrot.lane.b32.xlu1 %v1873_v38, %s1448_s18  ;;  %518 = vrot.lane.b32.xlu0 %v1875_v39, %s1448_s18 }
  0xc8   : > { %560 = vrot.lane.b32.xlu1 %v1882_v43, %s1448_s18  ;;  %558 = vrot.lane.b32.xlu0 %v1884_v44, %s1448_s18 }
  0xcc   : > { %752 = vrot.lane.b32.xlu1 %v1890_v45, %s1448_s18  ;;  %750 = vrot.lane.b32.xlu0 %v1892_v46, %s1448_s18 }
  0xd0   : > { %796 = vrot.lane.b32.xlu1 %v1900_v51, %s1448_s18  ;;  %794 = vrot.lane.b32.xlu0 %v1902_v52, %s1448_s18 }
  0xd4   : > { %836 = vrot.lane.b32.xlu1 %v1908_v57, %s1448_s18  ;;  %834 = vrot.lane.b32.xlu0 %v1910_v58, %s1448_s18 }
  0xd8   : > { %480 = vrot.lane.b32.xlu1 %v1917_v4, %s1448_s18  ;;  %478 = vrot.lane.b32.xlu0 %v1919_v5, %s1448_s18 }
  0xdc   : > { %756 = vrot.lane.b32.xlu1 %v1925_v8, %s1448_s18  ;;  %754 = vrot.lane.b32.xlu0 %v1927_v9, %s1448_s18 }
  0xf2   : > { %v513_v10 = vpop.permute.xlu1 %512  ;;  %v509_v13 = vpop.permute.xlu0 %508 }
  0xf3   : > { %v531_v20 = vadd.f32 %v509_v13, %v1710_v12  ;;  %v611_v21 = vsub.f32 %v1710_v12, %v509_v13  ;;  %v533_v42 = vadd.f32 %v513_v10, %v1708_v11  ;;  %v613_v49 = vsub.f32 %v1708_v11, %v513_v10 }
  0xf6   : > { %v549_v18 = vpop.permute.xlu1 %548  ;;  %v507_v19 = vpop.permute.xlu0 %506 }
  0xf7   : > { %v571_v24 = vadd.f32 %v549_v18, %v1719_v16  ;;  %v619_v33 = vsub.f32 %v1719_v16, %v549_v18  ;;  %v530_v50 = vadd.f32 %v507_v19, %v1721_v17  ;;  %v610_v53 = vsub.f32 %v1721_v17, %v507_v19 }
  0xf9   : > { %v579_v36 = vmax.f32 %v531_v20, %v571_v24  ;;  %v627_v37 = vmax.f32 %v611_v21, %v619_v33 }
  0xfa   : > { %v553_v56 = vpop.permute.xlu1 %552  ;;  %v547_v61 = vpop.permute.xlu0 %546 }
  0xfb   : > { %v573_v9 = vadd.f32 %v553_v56, %v1728_v22  ;;  %v621_v12 = vsub.f32 %v1728_v22, %v553_v56  ;;  %v570_v13 = vadd.f32 %v547_v61, %v1730_v23  ;;  %v618_v16 = vsub.f32 %v1730_v23, %v547_v61 }
  0xfd   : > { %v581_v18 = vmax.f32 %v533_v42, %v573_v9  ;;  %v629_v20 = vmax.f32 %v613_v49, %v621_v12  ;;  %v578_v21 = vmax.f32 %v530_v50, %v570_v13  ;;  %v626_v24 = vmax.f32 %v610_v53, %v618_v16 }
  0xfe   : > { %v511_v33 = vpop.permute.xlu1 %510  ;;  %v551_v11 = vpop.permute.xlu0 %550 }
  0xff   : > { %v532_v10 = vadd.f32 %v511_v33, %v1738_v26  ;;  %v612_v17 = vsub.f32 %v1738_v26, %v511_v33  ;;  %v572_v19 = vadd.f32 %v551_v11, %v1740_v27  ;;  %v620_v8 = vsub.f32 %v1740_v27, %v551_v11 }
 0x101   : > { %v580_v5 = vmax.f32 %v532_v10, %v572_v19  ;;  %v628_v22 = vmax.f32 %v612_v17, %v620_v8 }
 0x102   : > { %v1949_v56 = vpop.permute.xlu1 %784  ;;  %v1951_v4 = vpop.permute.xlu0 %782 }
 0x103   : > { %v1969_v17 = vadd.f32 %v1949_v56, %v1746_v28 }
 0x106   : > { %v1953_v23 = vpop.permute.xlu1 %788  ;;  %v1955_v9 = vpop.permute.xlu0 %786 }
 0x10a   : > { %v825_v42 = vpop.permute.xlu1 %824  ;;  %v1957_v49 = vpop.permute.xlu0 %822 }
 0x10b   : > { %v1972_v19 = vadd.f32 %v825_v42, %v1767_v34 }
 0x10e   : > { %v1959_v50 = vpop.permute.xlu1 %828  ;;  %v1961_v26 = vpop.permute.xlu0 %826 }
 0x112   : > { %v469_v53 = vpop.permute.xlu1 %468  ;;  %v467_v61 = vpop.permute.xlu0 %466 }
 0x113   : > { %v491_v27 = vadd.f32 %v469_v53, %v1788_v47  ;;  %v603_v8 = vsub.f32 %v1788_v47, %v469_v53  ;;  %v490_v12 = vadd.f32 %v467_v61, %v1790_v48  ;;  %v602_v13 = vsub.f32 %v1790_v48, %v467_v61 }
 0x115   : > { %v587_v16 = vsub.f32 %v491_v27, %v579_v36  ;;  %v635_v33 = vsub.f32 %v603_v8, %v627_v37  ;;  %v586_v11 = vsub.f32 %v490_v12, %v578_v21  ;;  %v634_v10 = vsub.f32 %v602_v13, %v626_v24 }
 0x116   : > { %v473_v58 = vpop.permute.xlu1 %472  ;;  %v471_v52 = vpop.permute.xlu0 %470 }
 0x117   : > { %v595_v57 = vand.u32 2147483647, %v587_v16  ;;  %v643_v47 = vand.u32 2147483647, %v635_v33  ;;  %v594_v53 = vand.u32 2147483647, %v586_v11  ;;  %v493_v48 = vadd.f32 %v473_v58, %v1799_v54 }
 0x118   : > { %v642_v36 = vand.u32 2147483647, %v634_v10  ;;  %v605_v37 = vsub.f32 %v1799_v54, %v473_v58  ;;  %v492_v21 = vadd.f32 %v471_v52, %v1801_v55  ;;  %v604_v24 = vsub.f32 %v1801_v55, %v471_v52 }
 0x119   : > { %v651_v61 = vmul.f32 0.045, %v595_v57  ;;  %v659_v27 = vmul.f32 0.105, %v643_v47  ;;  %v650_v8 = vmul.f32 0.045, %v594_v53  ;;  %v589_v12 = vsub.f32 %v493_v48, %v581_v18 }
 0x11a   : > { %v658_v13 = vmul.f32 0.105, %v642_v36  ;;  %v637_v51 = vsub.f32 %v605_v37, %v629_v20  ;;  %v588_v39 = vsub.f32 %v492_v21, %v580_v5  ;;  %v636_v16 = vsub.f32 %v604_v24, %v628_v22  ;;  %v1978_v33 = vpop.permute.xlu1 %516  ;;  %v1980_v11 = vpop.permute.xlu0 %514 }
 0x11b   : > { %v895_v10 = vsub.f32 %v1767_v34, %v825_v42  ;;  %v846_v54 = vadd.f32 %v1957_v49, %v1769_v35  ;;  %v667_v58 = vadd.f32 %v659_v27, %v651_v61  ;;  %v597_v38 = vand.u32 2147483647, %v589_v12 }
 0x11c   : > { %v666_v55 = vadd.f32 %v658_v13, %v650_v8  ;;  %v645_v52 = vand.u32 2147483647, %v637_v51  ;;  %v596_v57 = vand.u32 2147483647, %v588_v39  ;;  %v644_v47 = vand.u32 2147483647, %v636_v16 }
 0x11d   : > { %v887_v18 = vsub.f32 %v1746_v28, %v1949_v56  ;;  %v806_v5 = vadd.f32 %v1951_v4, %v1748_v29  ;;  %v886_v20 = vsub.f32 %v1748_v29, %v1951_v4  ;;  %v653_v22 = vmul.f32 0.045, %v597_v38 }
 0x11e   : > { %v809_v34 = vadd.f32 %v1953_v23, %v1754_v30  ;;  %v889_v42 = vsub.f32 %v1754_v30, %v1953_v23  ;;  %v661_v53 = vmul.f32 0.105, %v645_v52  ;;  %v652_v51 = vmul.f32 0.045, %v596_v57  ;;  %v1995_v39 = vpop.permute.xlu1 %556  ;;  %v1997_v48 = vpop.permute.xlu0 %554 }
 0x11f   : > { %v808_v28 = vadd.f32 %v1955_v9, %v1756_v31  ;;  %v888_v56 = vsub.f32 %v1756_v31, %v1955_v9  ;;  %v894_v29 = vsub.f32 %v1769_v35, %v1957_v49  ;;  %v660_v38 = vmul.f32 0.105, %v644_v47 }
 0x120   : > { %v855_v4 = vmax.f32 %v1969_v17, %v1972_v19  ;;  %v903_v30 = vmax.f32 %v887_v18, %v895_v10  ;;  %v854_v23 = vmax.f32 %v806_v5, %v846_v54  ;;  %v669_v36 = vadd.f32 %v661_v53, %v653_v22 }
 0x121   : > { %v849_v37 = vadd.f32 %v1959_v50, %v1777_v40  ;;  %v897_v21 = vsub.f32 %v1777_v40, %v1959_v50  ;;  %v848_v24 = vadd.f32 %v1961_v26, %v1779_v41  ;;  %v668_v31 = vadd.f32 %v660_v38, %v652_v51 }
 0x122   : > { %v896_v35 = vsub.f32 %v1779_v41, %v1961_v26  ;;  %v683_v9 = vsel %vm682_vm1, %v667_v58, 0.0  ;;  %v675_v49 = vsel %vm674_vm2, %v666_v55, 0.0  ;;  %v684_v17 = vsel %vm682_vm1, %v669_v36, 0.0  ;;  %v745_v19 = vpop.permute.xlu1 %744  ;;  %v743_v61 = vpop.permute.xlu0 %742 }
 0x123   : > { %v2018_v27 = vadd.f32 %v684_v17, %v683_v9  ;;  %v676_v8 = vsel %vm674_vm2, %v668_v31, 0.0  ;;  %v767_v40 = vadd.f32 %v745_v19, %v1825_v0  ;;  %v879_v50 = vsub.f32 %v1825_v0, %v745_v19 }
 0x124   : > { %v902_v12 = vmax.f32 %v886_v20, %v894_v29  ;;  %v2023_v13 = vadd.f32 %v676_v8, %v675_v49  ;;  %v766_v41 = vadd.f32 %v743_v61, %v1827_v1  ;;  %v878_v26 = vsub.f32 %v1827_v1, %v743_v61 }
 0x125   : > { %v857_v16 = vmax.f32 %v809_v34, %v849_v37  ;;  %v905_v10 = vmax.f32 %v889_v42, %v897_v21  ;;  %v863_v54 = vsub.f32 %v767_v40, %v855_v4  ;;  %v911_v58 = vsub.f32 %v879_v50, %v903_v30 }
 0x126   : > { %v856_v55 = vmax.f32 %v808_v28, %v848_v24  ;;  %v904_v52 = vmax.f32 %v888_v56, %v896_v35  ;;  %v862_v57 = vsub.f32 %v766_v41, %v854_v23  ;;  %v910_v47 = vsub.f32 %v878_v26, %v902_v12  ;;  %v749_v18 = vpop.permute.xlu1 %748  ;;  %v747_v5 = vpop.permute.xlu0 %746 }
 0x127   : > { %v871_v22 = vand.u32 2147483647, %v863_v54  ;;  %v919_v53 = vand.u32 2147483647, %v911_v58  ;;  %v769_v0 = vadd.f32 %v749_v18, %v1833_v2  ;;  %v881_v20 = vsub.f32 %v1833_v2, %v749_v18 }
 0x128   : > { %v870_v51 = vand.u32 2147483647, %v862_v57  ;;  %v918_v29 = vand.u32 2147483647, %v910_v47  ;;  %v768_v1 = vadd.f32 %v747_v5, %v1835_v3  ;;  %v880_v34 = vsub.f32 %v1835_v3, %v747_v5 }
 0x129   : > { %v927_v42 = vmul.f32 0.105, %v871_v22  ;;  %v935_v38 = vmul.f32 0.245, %v919_v53  ;;  %v865_v28 = vsub.f32 %v769_v0, %v857_v16  ;;  %v913_v56 = vsub.f32 %v881_v20, %v905_v10 }
 0x12a   : > { %v926_v4 = vmul.f32 0.105, %v870_v51  ;;  %v934_v30 = vmul.f32 0.245, %v918_v29  ;;  %v864_v23 = vsub.f32 %v768_v1, %v856_v55  ;;  %v912_v36 = vsub.f32 %v880_v34, %v904_v52  ;;  %v2031_v37 = vpop.permute.xlu1 %792  ;;  %v2033_v21 = vpop.permute.xlu0 %790 }
 0x12b   : > { %v873_v24 = vand.u32 2147483647, %v865_v28  ;;  %v921_v2 = vand.u32 2147483647, %v913_v56  ;;  %v690_v31 = vlaneseq  ;;  %v943_v49 = vadd.f32 %v935_v38, %v927_v42 }
 0x12c   : > { %v872_v35 = vand.u32 2147483647, %v864_v23  ;;  %v920_v9 = vand.u32 2147483647, %v912_v36  ;;  %v942_v19 = vadd.f32 %v934_v30, %v926_v4  ;;  %v535_v12 = vadd.f32 %v1978_v33, %v1808_v59 }
 0x12d   : > { %v929_v17 = vmul.f32 0.105, %v873_v24  ;;  %v937_v3 = vmul.f32 0.245, %v921_v2  ;;  %v615_v41 = vsub.f32 %v1808_v59, %v1978_v33  ;;  %v691_v16 = vshrl.u32 %v690_v31, 7 }
 0x12e   : > { %v928_v61 = vmul.f32 0.105, %v872_v35  ;;  %v936_v8 = vmul.f32 0.245, %v920_v9  ;;  %v833_v40 = vpop.permute.xlu1 %832  ;;  %v2035_v50 = vpop.permute.xlu0 %830  ;;  %v575_v10 = vadd.f32 %v1995_v39, %v1817_v62  ;;  %v623_v54 = vsub.f32 %v1817_v62, %v1995_v39 }
 0x12f   : > { %v945_v26 = vadd.f32 %v937_v3, %v929_v17  ;;  %v574_v58 = vadd.f32 %v1997_v48, %v1819_v63  ;;  %v534_v52 = vadd.f32 %v1980_v11, %v1810_v60  ;;  %v622_v57 = vsub.f32 %v1819_v63, %v1997_v48 }
 0x130   : > { %v944_v55 = vadd.f32 %v936_v8, %v928_v61  ;;  %v957_v59 = vsel %vm682_vm1, %v943_v49, 0.0  ;;  %v614_v47 = vsub.f32 %v1810_v60, %v1980_v11  ;;  %v950_v18 = vsel %vm674_vm2, %v942_v19, 0.0 }
 0x131   : > { %v958_v33 = vsel %vm682_vm1, %v945_v26, 0.0  ;;  %v583_v20 = vmax.f32 %v535_v12, %v575_v10  ;;  %v631_v51 = vmax.f32 %v615_v41, %v623_v54  ;;  %v582_v29 = vmax.f32 %v534_v52, %v574_v58 }
 0x132   : > { %v2057_v62 = vadd.f32 %v958_v33, %v957_v59  ;;  %v951_v39 = vsel %vm674_vm2, %v944_v55, 0.0  ;;  %v477_v5 = vpop.permute.xlu1 %476  ;;  %v475_v22 = vpop.permute.xlu0 %474  ;;  %v630_v11 = vmax.f32 %v614_v47, %v622_v57  ;;  %v692_v4 = vadd.s32 8, %v691_v16 }
 0x133   : > { %v2060_v53 = vadd.f32 %v951_v39, %v950_v18  ;;  %v495_v0 = vadd.f32 %v477_v5, %v1864_v25  ;;  %v607_v63 = vsub.f32 %v1864_v25, %v477_v5  ;;  %v494_v48 = vadd.f32 %v475_v22, %v1866_v32 }
 0x134   : > { %v606_v60 = vsub.f32 %v1866_v32, %v475_v22  ;;  %v851_v30 = vadd.f32 %v833_v40, %v1853_v14  ;;  %v899_v25 = vsub.f32 %v1853_v14, %v833_v40  ;;  %v811_v32 = vadd.f32 %v2031_v37, %v1843_v6 }
 0x135   : > { %v591_v1 = vsub.f32 %v495_v0, %v583_v20  ;;  %v639_v34 = vsub.f32 %v607_v63, %v631_v51  ;;  %v590_v42 = vsub.f32 %v494_v48, %v582_v29  ;;  %v891_v49 = vsub.f32 %v1843_v6, %v2031_v37  ;;  %v2276_v20 = vld [vmem:[#allocation15_spill] sm:$0xff] }
 0x136   : > { %v2066_v38 = vpop.permute.xlu1 %520  ;;  %v2068_v28 = vpop.permute.xlu0 %518  ;;  %v638_v56 = vsub.f32 %v606_v60, %v630_v11  ;;  %v697_v17 = vand.u32 1, %v691_v16  ;;  %v704_v3 = vand.u32 1, %v692_v4  ;;  %v810_v19 = vadd.f32 %v2033_v21, %v1845_v7 }
 0x137   : > { %v599_v23 = vand.u32 2147483647, %v591_v1  ;;  %v647_v36 = vand.u32 2147483647, %v639_v34  ;;  %v598_v24 = vand.u32 2147483647, %v590_v42  ;;  %v859_v61 = vmax.f32 %v811_v32, %v851_v30 }
 0x138   : > { %v646_v9 = vand.u32 2147483647, %v638_v56  ;;  %v850_v14 = vadd.f32 %v2035_v50, %v1855_v15  ;;  %v898_v8 = vsub.f32 %v1855_v15, %v2035_v50  ;;  %v907_v40 = vmax.f32 %v891_v49, %v899_v25  ;;  %v2277_v34 = vld [vmem:[#allocation16_spill] sm:$0xff]  ;;  %v2278_v49 = vld [vmem:[#allocation17_spill] sm:$0xff] }
 0x139   : > { %v655_v12 = vmul.f32 0.045, %v599_v23  ;;  %v663_v41 = vmul.f32 0.105, %v647_v36  ;;  %v654_v26 = vmul.f32 0.045, %v598_v24  ;;  %v890_v55 = vsub.f32 %v1845_v7, %v2033_v21 }
 0x13a   : > { %v561_v2 = vpop.permute.xlu1 %560  ;;  %v559_v35 = vpop.permute.xlu0 %558  ;;  %v662_v58 = vmul.f32 0.105, %v646_v9  ;;  %v858_v57 = vmax.f32 %v810_v19, %v850_v14  ;;  %vm2088_vm3 = vcmp.eq.s32.totalorder %v697_v17, 0  ;;  %vm2092_vm4 = vcmp.eq.s32.totalorder %v704_v3, 0  ;;  %v2279_v3 = vld [vmem:[#allocation19_spill] sm:$0xff] }
 0x13b   : > { %v906_v33 = vmax.f32 %v890_v55, %v898_v8  ;;  %v671_v47 = vadd.f32 %v663_v41, %v655_v12  ;;  %v577_v7 = vadd.f32 %v561_v2, %v1882_v43  ;;  %v576_v22 = vadd.f32 %v559_v35, %v1884_v44 }
 0x13c   : > { %v670_v5 = vadd.f32 %v662_v58, %v654_v26  ;;  %v537_v51 = vadd.f32 %v2066_v38, %v2276_v20  ;;  %v617_v29 = vsub.f32 %v2276_v20, %v2066_v38  ;;  %v624_v60 = vsub.f32 %v1884_v44, %v559_v35  ;;  %v2282_v58 = vld [vmem:[#allocation21_spill] sm:$0xff] }
 0x13d   : > { %v1449_v11 = vmov 0.0   ;;  %v536_v42 = vadd.f32 %v2068_v28, %v2277_v34  ;;  %v616_v56 = vsub.f32 %v2277_v34, %v2068_v28 }
 0x13e   : > { %v753_v10 = vpop.permute.xlu1 %752  ;;  %v751_v54 = vpop.permute.xlu0 %750  ;;  %v2107_v1 = vsel %vm2088_vm3, 1.0, %v1449_v11  ;;  %v2117_v44 = vsel %vm2092_vm4, 1.0, %v1449_v11  ;;  %v678_v38 = vsel %vm674_vm2, %v670_v5, 0.0  ;;  %v585_v25 = vmax.f32 %v537_v51, %v577_v7 }
 0x13f   : > { %v771_v6 = vadd.f32 %v753_v10, %v1890_v45  ;;  %v883_v37 = vsub.f32 %v1890_v45, %v753_v10  ;;  %v770_v16 = vadd.f32 %v751_v54, %v1892_v46  ;;  %v882_v52 = vsub.f32 %v1892_v46, %v751_v54 }
 0x140   : > { %v625_v46 = vsub.f32 %v1882_v43, %v561_v2  ;;  %v686_v43 = vsel %vm682_vm1, %v671_v47, 0.0  ;;  %v584_v24 = vmax.f32 %v536_v42, %v576_v22  ;;  %v632_v9 = vmax.f32 %v616_v56, %v624_v60  ;;  %v2285_v60 = vld [vmem:[#allocation24_spill] sm:$0xff] }
 0x141   : > { %v867_v15 = vsub.f32 %v771_v6, %v859_v61  ;;  %v915_v50 = vsub.f32 %v883_v37, %v907_v40  ;;  %v866_v21 = vsub.f32 %v770_v16, %v858_v57  ;;  %v914_v48 = vsub.f32 %v882_v52, %v906_v33  ;;  %v2280_v61 = vld [vmem:[#allocation18_spill] sm:$0xff]  ;;  %v2281_v40 = vld [vmem:[#allocation20_spill] sm:$0xff] }
 0x142   : > { %v797_v18 = vpop.permute.xlu1 %796  ;;  %v795_v39 = vpop.permute.xlu0 %794  ;;  %v633_v23 = vmax.f32 %v617_v29, %v625_v46  ;;  %v2283_v16 = vld [vmem:[#allocation22_spill] sm:$0xff] }
 0x143   : > { %v875_v0 = vand.u32 2147483647, %v867_v15  ;;  %v923_v63 = vand.u32 2147483647, %v915_v50  ;;  %v874_v36 = vand.u32 2147483647, %v866_v21  ;;  %v813_v17 = vadd.f32 %v797_v18, %v2278_v49 }
 0x144   : > { %v922_v32 = vand.u32 2147483647, %v914_v48  ;;  %v893_v28 = vsub.f32 %v2278_v49, %v797_v18  ;;  %v812_v14 = vadd.f32 %v795_v39, %v2280_v61  ;;  %v892_v54 = vsub.f32 %v2280_v61, %v795_v39  ;;  %v2284_v48 = vld [vmem:[#allocation23_spill] sm:$0xff] }
 0x145   : > { %v931_v2 = vmul.f32 0.105, %v875_v0  ;;  %v939_v35 = vmul.f32 0.245, %v923_v63  ;;  %v930_v57 = vmul.f32 0.105, %v874_v36  ;;  %v679_v61 = vadd.f32 %v678_v38, %v2023_v13 }
 0x146   : > { %v837_v4 = vpop.permute.xlu1 %836  ;;  %v835_v30 = vpop.permute.xlu0 %834  ;;  %v938_v15 = vmul.f32 0.245, %v922_v32 }
 0x147   : > { %v853_v19 = vadd.f32 %v837_v4, %v2279_v3  ;;  %v901_v8 = vsub.f32 %v2279_v3, %v837_v4  ;;  %v852_v12 = vadd.f32 %v835_v30, %v2281_v40  ;;  %v900_v41 = vsub.f32 %v2281_v40, %v835_v30 }
 0x148   : > { %v947_v52 = vadd.f32 %v939_v35, %v931_v2  ;;  %v687_v35 = vadd.f32 %v686_v43, %v2018_v27  ;;  %v946_v32 = vadd.f32 %v938_v15, %v930_v57 }
 0x149   : > { %v861_v59 = vmax.f32 %v813_v17, %v853_v19  ;;  %v909_v45 = vmax.f32 %v893_v28, %v901_v8  ;;  %v860_v5 = vmax.f32 %v812_v14, %v852_v12  ;;  %v908_v7 = vmax.f32 %v892_v54, %v900_v41 }
 0x14a   : > { %v481_v26 = vpop.permute.xlu1 %480  ;;  %v479_v10 = vpop.permute.xlu0 %478  ;;  %v960_v14 = vsel %vm682_vm1, %v947_v52, 0.0  ;;  %v953_v27 = vsel %vm674_vm2, %v946_v32, 0.0 }
 0x14b   : > { %v497_v6 = vadd.f32 %v481_v26, %v2282_v58  ;;  %v609_v37 = vsub.f32 %v2282_v58, %v481_v26  ;;  %v496_v55 = vadd.f32 %v479_v10, %v2283_v16  ;;  %v608_v50 = vsub.f32 %v2283_v16, %v479_v10 }
 0x14c   : > { %v954_v16 = vadd.f32 %v953_v27, %v2060_v53 }
 0x14d   : > { %v593_v33 = vsub.f32 %v497_v6, %v585_v25  ;;  %v641_v47 = vsub.f32 %v609_v37, %v633_v23  ;;  %v592_v18 = vsub.f32 %v496_v55, %v584_v24  ;;  %v640_v46 = vsub.f32 %v608_v50, %v632_v9 }
 0x14e   : > { %v757_v39 = vpop.permute.xlu1 %756  ;;  %v755_v21 = vpop.permute.xlu0 %754  ;;  %v961_v37 = vadd.f32 %v960_v14, %v2057_v62 }
 0x14f   : > { %v601_v22 = vand.u32 2147483647, %v593_v33  ;;  %v649_v0 = vand.u32 2147483647, %v641_v47  ;;  %v600_v63 = vand.u32 2147483647, %v592_v18  ;;  %v773_v20 = vadd.f32 %v757_v39, %v2284_v48 }
 0x150   : > { %v648_v51 = vand.u32 2147483647, %v640_v46  ;;  %v885_v29 = vsub.f32 %v2284_v48, %v757_v39  ;;  %v772_v34 = vadd.f32 %v755_v21, %v2285_v60  ;;  %v884_v42 = vsub.f32 %v2285_v60, %v755_v21 }
 0x151   : > { %v657_v56 = vmul.f32 0.045, %v601_v22  ;;  %v665_v4 = vmul.f32 0.105, %v649_v0  ;;  %v656_v30 = vmul.f32 0.045, %v600_v63  ;;  %v869_v25 = vsub.f32 %v773_v20, %v861_v59 }
 0x152   : > { %v664_v23 = vmul.f32 0.105, %v648_v51  ;;  %v917_v36 = vsub.f32 %v885_v29, %v909_v45  ;;  %v868_v24 = vsub.f32 %v772_v34, %v860_v5  ;;  %v916_v2 = vsub.f32 %v884_v42, %v908_v7 }
 0x153   : > { %v673_v9 = vadd.f32 %v665_v4, %v657_v56  ;;  %v877_v49 = vand.u32 2147483647, %v869_v25  ;;  %v977_v21 = vand.u32 127, %v690_v31 }
 0x154   : > { %v672_v17 = vadd.f32 %v664_v23, %v656_v30  ;;  %v925_v28 = vand.u32 2147483647, %v917_v36  ;;  %v876_v3 = vand.u32 2147483647, %v868_v24  ;;  %v924_v19 = vand.u32 2147483647, %v916_v2 }
 0x155   : > { %v688_v8 = vsel %vm682_vm1, %v673_v9, 0.0  ;;  %v933_v40 = vmul.f32 0.105, %v877_v49  ;;  %v982_v48 = vand.u32 1, %v977_v21 }
 0x156   : > { %v689_v12 = vadd.f32 %v688_v8, %v687_v35  ;;  %v680_v41 = vsel %vm674_vm2, %v672_v17, 0.0  ;;  %v941_v26 = vmul.f32 0.245, %v925_v28  ;;  %v932_v10 = vmul.f32 0.105, %v876_v3 }
 0x157   : > { %v681_v43 = vadd.f32 %v680_v41, %v679_v61  ;;  %v940_v54 = vmul.f32 0.245, %v924_v19  ;;  %vm990_vm5 = vcmp.eq.s32.totalorder %v982_v48, 0 }
 0x158   : > { %v949_v58 = vadd.f32 %v941_v26, %v933_v40  ;;  %v724_v6 = vmul.f32 %v2117_v44, %v689_v12  ;;  %v1176_v60 = vsel %vm990_vm5, 1.0, %v1449_v11 }
 0x159   : > { %v948_v13 = vadd.f32 %v940_v54, %v932_v10  ;;  %v723_v38 = vmul.f32 %v2107_v1, %v681_v43 }
 0x15a   : > { %v962_v55 = vsel %vm682_vm1, %v949_v58, 0.0  ;;  %v726_v52 = vsel %vm682_vm1, %v724_v6, 0.0 }
 0x15b   : > { %v963_v57 = vadd.f32 %v962_v55, %v961_v37  ;;  %v955_v15 = vsel %vm674_vm2, %v948_v13, 0.0  ;;  %v725_v50 = vsel %vm674_vm2, %v723_v38, 0.0 }
 0x15c   : > { %v956_v59 = vadd.f32 %v955_v15, %v954_v16  ;;  %v727_v33 = vadd.f32 %v726_v52, %v725_v50 }
 0x15d   : > { %v965_v47 = vmul.f32 %v2117_v44, %v963_v57 }
 0x15e   : > { %v728_v18 = vrot.slane %v727_v33, 4  ;;  %v964_v62 = vmul.f32 %v2107_v1, %v956_v59 }
 0x15f   : > { %v967_v45 = vsel %vm682_vm1, %v965_v47, 0.0 }
 0x160   : > { %v729_v5 = vadd.f32 %v728_v18, %v727_v33  ;;  %v966_v53 = vsel %vm674_vm2, %v964_v62, 0.0 }
 0x161   : > { %v968_v7 = vadd.f32 %v967_v45, %v966_v53 }
 0x162   : > { %v730_v46 = vrot.slane %v729_v5, 2 }
 0x163   : > { %v969_v39 = vrot.slane %v968_v7, 4 }
 0x164   : > { %v731_v22 = vadd.f32 %v730_v46, %v729_v5 }
 0x165   : > { %v970_v0 = vadd.f32 %v969_v39, %v968_v7 }
 0x166   : > { %v732_v20 = vrot.slane %v731_v22, 1 }
 0x167   : > { %v971_v63 = vrot.slane %v970_v0, 2 }
 0x168   : > { %v733_v29 = vadd.f32 %v732_v20, %v731_v22 }
 0x169   : > { %v972_v51 = vadd.f32 %v971_v63, %v970_v0 }
 0x16b   : > { %v973_v44 = vrot.slane %v972_v51, 1 }
 0x16d   : > { %v974_v1 = vadd.f32 %v973_v44, %v972_v51 }
 0x16f   : > { %v975_v34 = vadd.f32 %v974_v1, %v733_v29 }
 0x171   : > { %v993_v42 = vmul.f32 %v1176_v60, %v975_v34 }
 0x173   : > { %v995_v56 = vsel %vm994_vm6, %v993_v42, 0.0 }
 0x174   : > { %996 = vadd.xlane.f32.xlu0 %v995_v56 }
 0x201   : > { %v997_v31 = vpop.xlane.xlu0 %996 }
 0x202   : > { %v998_v4 = vrot.slane %v997_v31, 4 }
 0x204   : > { %v999_v30 = vadd.f32 %v998_v4, %v997_v31 }
 0x206   : > { %v1000_v25 = vrot.slane %v999_v30, 2 }
 0x208   : > { %v1001_v23 = vadd.f32 %v1000_v25, %v999_v30 }
 0x20a   : > { %v1002_v36 = vrot.slane %v1001_v23, 1 }
 0x20c   : > { %v1003_v24 = vadd.f32 %v1002_v36, %v1001_v23 }
 0x20e   : > { %1187 = vpush %v1003_v24 }
 0x23f   : > { %s1188_s30 = spop %1187 }
 0x240   : > { %v1005_v11 = vstv %s1188_s30 }
 0x241   : > { %1006 = vst [vmem:[%s294_s20] sm:$0xff] %v1005_v11 }
 0x242   : > { %1368 = shalt.err (!%p1365_p13)
}
 0x243   : > { %s1369_s21 = scalar_lea.hbm %s2163_s26, 128  ;;  %s1373_s22 = scalar_lea.hbm %s2213_s3, 256 }
 0x244   : > { %p1370_p11 = scmp.ne.s32.totalorder %s2163_s26, %s1369_s21  ;;  %p1374_p7 = scmp.lt.u32.totalorder %s2163_s26, %s2213_s3 }
 0x245   : > { %p1375_p4 = scmp.lt.u32.totalorder %s1373_s22, %s1369_s21  ;;  %p1377_p0 = scmp.lt.u32.totalorder %s1369_s21, %s2163_s26 }
 0x246   : > { %p1371_p2 = pnand %p1370_p11, %p2286_p10 }
 0x247   : > { %p1376_p3 = por %p1375_p4, %p1374_p7 }
 0x248   : > { %p1372_p5 = pneg %p1371_p2 }
 0x249   : > { %p1378_p8 = por %p1377_p0, %p1376_p3 }
 0x24b   : > { %p1379_p9 = pnand %p1378_p8, %p1372_p5 }
 0x24d   : > { %1382 = shalt.err (!%p1379_p9)
}
 0x24e   : > { %1195 = dma.vmem_to_hbm [thread:$0]  (%p2286_p10), %s2158_s5, 128, %s2163_s26, %s1008_s1  }
 0x24f PF: > { %s1034_s9 = sand.u32 1, %s1421_s12   ;;  %p2287_p12 = scmp.ne.s32.totalorder %s2250_s27, 0 }
 0x250   : > { %p2288_p1 = scmp.ge.s32.totalorder %s1441_s17, 2  ;;  %s1035_s18 = scalar_lea.sflag [#allocation4], %s1034_s9 }
 0x252   : > { %p1208_p6 = pnand %p2288_p1, %p2287_p12 }
 0x254   : > { %1416 = dma.done.wait (!%p1208_p6), %s1035_s18, 128  }
 0x255   : > { %1418 = vsyncadd (!%p1208_p6), %s1035_s18, 4294967168  ;;  %s22_s17 = sadd.s32 1, %s1441_s17   ;;  %s2289_s25 = sld [smem:[#allocation14_spill]] }
 0x256   : > { %p19_p13 = scmp.ge.s32.totalorder %s22_s17, 4   ;;  %s2290_s15 = sld [smem:[#allocation12_spill]] }
 0x257   : > { %s2291_s16 = sld [smem:[#allocation13_spill]]  ;;  %s2292_s12 = smov %s1425_s13 }
 0x258   : > { %s2293_s13 = smov %s1429_s14  ;;  %21 = sbr.rel (!%p19_p13) target bundleno = 10 (0xa), region = 101 }
 0x25b   : > { %s2294_s14 = smov %s2289_s25 }
 0x25f   :  { %1040 = vsyncpa [#allocation3], 1 }
 0x260   :  { %1042 = vsyncpa [#allocation3 + $0x1], 1 }
 0x261   :  { %1043 = vsyncpa [#allocation6], 1 }
 0x262   :  { %1045 = vsyncpa [#allocation6 + $0x1], 1 }
 0x263   :  { %1046 = vsyncpa [#allocation4], 1 }
 0x264   :  { %1048 = vsyncpa [#allocation4 + $0x1], 1 }

</bundles_post_ra>
